<compile_context>
chip_gen: v7x
topology: tpu7x:2x2x1
jax: 0.10.0
libtpu: 0.0.40
codegen_flags: <defaults>
</compile_context>

<pallas_src>
from functools import lru_cache

import jax
import jax.numpy as jnp
from jax.experimental import pallas as pl
from jax.experimental.pallas import tpu as pltpu

_SSIM_W = 0.85
_DISP_SMOOTH_W = 0.1
_SF_3D_SM = 200.0
_WEIGHTS = (4.0, 2.0, 1.0, 1.0, 1.0)

_ROW_TILE_TARGET = 128   # rows per in-kernel chunk at large H (v7x VMEM-friendly)
_HALO = 8                # aligned halo rows above/below each chunk


def _vmem_limit_bytes():
    """Generation-aware scoped-VMEM limit (leave headroom on v7x, use v5e/v6e)."""
    try:
        info = pltpu.get_tpu_info()
        cap = int(getattr(info, "vmem_capacity_bytes", 128 * 1024 * 1024))
    except Exception:
        cap = 128 * 1024 * 1024
    return int(min(max(cap - 16 * 1024 * 1024, 32 * 1024 * 1024), 100 * 1024 * 1024))


def _choose_row_tile(H, target=None):
    """Pick an in-kernel row-chunk height (multiple of 8, needs H >= TH + 16)."""
    target = _ROW_TILE_TARGET if target is None else int(target)
    if H <= target:
        return H, 1
    th = max(8, (target // 8) * 8)
    if H % 8 != 0 or H < th + 2 * _HALO:
        return H, 1          # alignment / halo constraints not met -> whole image
    return th, -(-H // th)   # ceil-div; a ragged last chunk is handled in-kernel


# ---------------------------------------------------------------------------
# Fused Pallas kernel: photometric diff + edge-aware 2nd-order smoothness,
# reduced in-kernel to three partial sums per batch element:
#   lane 0: sum( photometric * occ_mask )
#   lane 1: sum( occ_mask )
#   lane 2: sum( smoothness [* per-pixel weight] )
# ---------------------------------------------------------------------------
@lru_cache(maxsize=None)
def _build_fused_loss_kernel(Btot, C, Cs, H, W, ssim_w, beta, has_sw,
                             row_tile, n_chunks):
    assert H >= 3 and W >= 3, "SSIM needs H, W >= 3"
    ssim_w = float(ssim_w)
    beta = float(beta)
    C1 = 0.01 ** 2
    C2 = 0.03 ** 2
    inv9 = 1.0 / 9.0

    TH = int(row_tile)
    chunked = n_chunks > 1
    Sh = TH + 2 * _HALO if chunked else H
    if chunked:
        assert H % 8 == 0 and TH % 8 == 0 and H >= Sh

    def _box3(t):
        # separable 3x3 box filter; circular wraps only pollute rows/cols that
        # are later zeroed by the interior mask or lie in the discarded halo.
        hp = pltpu.roll(t, 1, axis=2) + t + pltpu.roll(t, W - 1, axis=2)
        return (pltpu.roll(hp, 1, axis=1) + hp + pltpu.roll(hp, Sh - 1, axis=1)) * inv9

    def kernel(*refs):
        if has_sw:
            a_ref, b_ref, occ_ref, sf_ref, sw_ref, o_ref = refs
        else:
            a_ref, b_ref, occ_ref, sf_ref, o_ref = refs
            sw_ref = None

        t = pl.program_id(1)

        @pl.when(t == 0)
        def _init():
            o_ref[...] = jnp.zeros_like(o_ref)

        if chunked:
            r0 = t * TH
            rs = jnp.clip(r0 - _HALO, 0, H - Sh)
            rs = pl.multiple_of(rs, 8)           # aligned sublane slice start
            c0 = r0 - rs                         # chunk offset inside the slab
            rsl = pl.ds(rs, Sh)
            x = a_ref[0, :, rsl, :].astype(jnp.float32)        # (C, Sh, W)
            y = b_ref[0, :, rsl, :].astype(jnp.float32)
            occ = occ_ref[0, 0, rsl, :].astype(jnp.float32)    # (Sh, W)
            s = sf_ref[0, :, rsl, :].astype(jnp.float32)       # (Cs, Sh, W)
            sw = sw_ref[0, 0, rsl, :].astype(jnp.float32) if has_sw else None
        else:
            rs = 0
            c0 = 0
            x = a_ref[0].astype(jnp.float32)
            y = b_ref[0].astype(jnp.float32)
            occ = occ_ref[0, 0].astype(jnp.float32)
            s = sf_ref[0].astype(jnp.float32)
            sw = sw_ref[0, 0].astype(jnp.float32) if has_sw else None

        row_l = jax.lax.broadcasted_iota(jnp.int32, (Sh, W), 0)   # slab-local row
        col_i = jax.lax.broadcasted_iota(jnp.int32, (Sh, W), 1)
        g = row_l + rs if chunked else row_l                       # global row

        # ---------------- photometric: L1 + SSIM ---------------------------
        # Reference broadcasts the (B,1,H,W) channel-sum L1 against the
        # (B,C,H,W) SSIM map and takes .mean(dim=1):
        #   combined = (1-w)*sum_c|a-b| + w*mean_c(SSIM)   -- computed here.
        l1 = jnp.sum(jnp.abs(y - x), axis=0)                       # (Sh, W)

        # moments filtered one at a time (no 5C concat -> lower peak VMEM)
        mu_x = _box3(x)
        mu_y = _box3(y)
        e_xx = _box3(x * x)
        e_yy = _box3(y * y)
        e_xy = _box3(x * y)
        mu_xy = mu_x * mu_y
        mu_x2 = mu_x * mu_x
        mu_y2 = mu_y * mu_y
        sig_x = e_xx - mu_x2
        sig_y = e_yy - mu_y2
        sig_xy = e_xy - mu_xy
        ssim_n = (2.0 * mu_xy + C1) * (2.0 * sig_xy + C2)
        ssim_d = (mu_x2 + mu_y2 + C1) * (sig_x + sig_y + C2)       # > 0
        ssim = jnp.clip((1.0 - ssim_n / ssim_d) * 0.5, 0.0, 1.0)
        ssim_mean = jnp.mean(ssim, axis=0)                          # (Sh, W)
        interior = ((g >= 1) & (g <= H - 2) & (col_i >= 1) & (col_i <= W - 2))
        photo = (1.0 - ssim_w) * l1 + ssim_w * jnp.where(interior, ssim_mean, 0.0)

        # ------------- edge-aware 2nd-order smoothness ---------------------
        # first-order (replicate) image gradients via roll + edge fix
        # (diff == 0 on the replicated edge, so the weight is exactly 1 there).
        x_r = pltpu.roll(x, W - 1, axis=2)      # x[:, :, c+1 (mod W)]
        x_d = pltpu.roll(x, Sh - 1, axis=1)     # x[:, r+1 (mod Sh), :]
        wx = jnp.exp(-beta * jnp.mean(jnp.abs(x - x_r), axis=0))
        wy = jnp.exp(-beta * jnp.mean(jnp.abs(x - x_d), axis=0))
        wx = jnp.where(col_i == W - 1, 1.0, wx)
        wy = jnp.where(g == H - 1, 1.0, wy)

        # second-order (replicate) field gradients: circular neighbor sums via
        # roll, image borders fixed explicitly (halo-row pollution is discarded
        # by the chunk mask below).
        nbr_x = pltpu.roll(s, 1, axis=2) + pltpu.roll(s, W - 1, axis=2)
        nbr_x = jnp.where(col_i == 0, s[:, :, 0:1] + s[:, :, 1:2], nbr_x)
        nbr_x = jnp.where(col_i == W - 1,
                          s[:, :, W - 2:W - 1] + s[:, :, W - 1:W], nbr_x)
        sf_gx = nbr_x - 2.0 * s

        nbr_y = pltpu.roll(s, 1, axis=1) + pltpu.roll(s, Sh - 1, axis=1)
        nbr_y = jnp.where(g == 0, s[:, 0:1, :] + s[:, 1:2, :], nbr_y)
        nbr_y = jnp.where(g == H - 1,
                          s[:, Sh - 2:Sh - 1, :] + s[:, Sh - 1:Sh, :], nbr_y)
        sf_gy = nbr_y - 2.0 * s

        sm = jnp.sum(jnp.abs(sf_gx) * wx + jnp.abs(sf_gy) * wy, axis=0)  # (Sh, W)
        if has_sw:
            sm = sm * sw

        if chunked:
            center = ((row_l >= c0) & (row_l < c0 + TH)).astype(jnp.float32)
            occ_c = occ * center
            sm_c = sm * center
        else:
            occ_c = occ
            sm_c = sm

        s_photo = jnp.sum(photo * occ_c)
        s_occ = jnp.sum(occ_c)
        s_smooth = jnp.sum(sm_c)

        # pack the three partial sums into lanes 0..2 of a (1,128) output row
        lane = jax.lax.broadcasted_iota(jnp.int32, (1, 128), 1)
        row = (jnp.where(lane == 0, s_photo, 0.0)
               + jnp.where(lane == 1, s_occ, 0.0)
               + jnp.where(lane == 2, s_smooth, 0.0))
        o_ref[0] = o_ref[0] + row

    in_specs = [
        pl.BlockSpec((1, C, H, W), lambda b, t: (b, 0, 0, 0)),
        pl.BlockSpec((1, C, H, W), lambda b, t: (b, 0, 0, 0)),
        pl.BlockSpec((1, 1, H, W), lambda b, t: (b, 0, 0, 0)),
        pl.BlockSpec((1, Cs, H, W), lambda b, t: (b, 0, 0, 0)),
    ]
    if has_sw:
        in_specs.append(pl.BlockSpec((1, 1, H, W), lambda b, t: (b, 0, 0, 0)))

    planes_in = 2 * C + 1 + Cs + (1 if has_sw else 0)
    cost = pl.CostEstimate(
        flops=int(Btot * H * W * (70 * C + 30 * Cs + 40)),
        transcendentals=int(Btot * H * W * (2 + C)),
        bytes_accessed=int(Btot * H * W * 4 * planes_in + Btot * 128 * 4),
    )

    return pl.pallas_call(
        kernel,
        out_shape=jax.ShapeDtypeStruct((Btot, 1, 128), jnp.float32),
        grid_spec=pltpu.PrefetchScalarGridSpec(
            num_scalar_prefetch=0,
            grid=(Btot, n_chunks),
            in_specs=in_specs,
            out_specs=pl.BlockSpec((1, 1, 128), lambda b, t: (b, 0, 0)),
        ),
        compiler_params=pltpu.CompilerParams(
            dimension_semantics=("parallel", "arbitrary"),
            vmem_limit_bytes=_vmem_limit_bytes(),
        ),
        cost_estimate=cost,
    )


def fused_photo_smooth_sums(img_a, img_b, occ, sf, sweight=None,
                            ssim_w=_SSIM_W, beta=10.0, row_tile=None):
    """Per-batch-element sums: (sum(photo*occ), sum(occ), sum(smooth[*sweight])).

    Each returned array has shape (B,).  `sweight=None` specializes the kernel
    so the all-ones weight plane is never read from HBM.
    """
    B, C, H, W = img_a.shape
    Cs = sf.shape[1]
    TH, n_chunks = _choose_row_tile(H, row_tile)
    has_sw = sweight is not None
    call = _build_fused_loss_kernel(B, C, Cs, H, W, float(ssim_w), float(beta),
                                    has_sw, TH, n_chunks)
    args = [img_a.astype(jnp.float32), img_b.astype(jnp.float32),
            occ.astype(jnp.float32), sf.astype(jnp.float32)]
    if has_sw:
        args.append(sweight.astype(jnp.float32))
    out = call(*args)
    return out[:, 0, 0], out[:, 0, 1], out[:, 0, 2]


# ---------------------------------------------------------------------------
# Plain-JAX glue: resizing, warping (gather/scatter), camera geometry.
# ---------------------------------------------------------------------------
def bilinear_resize_ac(x, out_h, out_w):
    """Bilinear resize with align_corners=True."""
    B, C, H, W = x.shape
    if (H, W) == (out_h, out_w):
        return x
    ys = jnp.linspace(0.0, H - 1.0, out_h)
    xs = jnp.linspace(0.0, W - 1.0, out_w)
    y0f = jnp.floor(ys)
    x0f = jnp.floor(xs)
    y0 = jnp.clip(y0f.astype(jnp.int32), 0, H - 1)
    y1 = jnp.clip(y0 + 1, 0, H - 1)
    x0 = jnp.clip(x0f.astype(jnp.int32), 0, W - 1)
    x1 = jnp.clip(x0 + 1, 0, W - 1)
    wy = (ys - y0f)[None, None, :, None]
    wx = (xs - x0f)[None, None, None, :]
    rows = x[:, :, y0, :] * (1.0 - wy) + x[:, :, y1, :] * wy
    return rows[:, :, :, x0] * (1.0 - wx) + rows[:, :, :, x1] * wx


# TODO(synk): gather-based bilinear grid_sample stays in plain JAX.
def _bilinear_gather(img, grid):
    """grid_sample(img, grid, bilinear, zeros padding, align_corners=True).
    Returns (warped, weight_sum); weight_sum == grid_sample(ones, grid)."""
    B, C, H, W = img.shape
    ix = (grid[..., 0] + 1.0) * 0.5 * (W - 1)
    iy = (grid[..., 1] + 1.0) * 0.5 * (H - 1)
    x0 = jnp.floor(ix)
    y0 = jnp.floor(iy)
    imgp = jnp.transpose(img, (0, 2, 3, 1))  # (B,H,W,C)
    bidx = jnp.arange(B)[:, None, None]
    out = jnp.zeros((B,) + grid.shape[1:3] + (C,), img.dtype)
    wsum = jnp.zeros((B,) + grid.shape[1:3], img.dtype)
    for dx in (0, 1):
        for dy in (0, 1):
            xi = x0 + dx
            yi = y0 + dy
            w = (1.0 - jnp.abs(ix - xi)) * (1.0 - jnp.abs(iy - yi))
            valid = (xi >= 0) & (xi <= W - 1) & (yi >= 0) & (yi <= H - 1)
            wv = w * valid.astype(img.dtype)
            xc = jnp.clip(xi, 0, W - 1).astype(jnp.int32)
            yc = jnp.clip(yi, 0, H - 1).astype(jnp.int32)
            out = out + imgp[bidx, yc, xc] * wv[..., None]
            wsum = wsum + wv
    return jnp.transpose(out, (0, 3, 1, 2)), wsum[:, None]


def grid_sample_bilinear(img, grid):
    warp, _ = _bilinear_gather(img, grid)
    return warp


# TODO(synk): forward-warp (scatter-add splat) stays in plain JAX; the
#             duplicate-index scatter is likely the end-to-end bottleneck.
def _forward_warp_ones(flow):
    """Bilinearly splat ones along flow. flow: (B,H,W,2) pixel (x,y) offsets."""
    B, H, W, _ = flow.shape
    xx = jnp.arange(W, dtype=flow.dtype)[None, None, :]
    yy = jnp.arange(H, dtype=flow.dtype)[None, :, None]
    tx = xx + flow[..., 0]
    ty = yy + flow[..., 1]
    x0 = jnp.floor(tx)
    y0 = jnp.floor(ty)
    out = jnp.zeros((B, H, W), flow.dtype)
    bidx = jnp.broadcast_to(jnp.arange(B)[:, None, None], (B, H, W))
    for dx in (0, 1):
        for dy in (0, 1):
            xi = x0 + dx
            yi = y0 + dy
            w = (1.0 - jnp.abs(tx - xi)) * (1.0 - jnp.abs(ty - yi))
            valid = (xi >= 0) & (xi <= W - 1) & (yi >= 0) & (yi <= H - 1)
            w = w * valid.astype(flow.dtype)
            xc = jnp.clip(xi, 0, W - 1).astype(jnp.int32)
            yc = jnp.clip(yi, 0, H - 1).astype(jnp.int32)
            out = out.at[bidx, yc, xc].add(w)
    return out[:, None]  # (B,1,H,W)


def adaptive_disocc_detection(flow):  # flow (B,2,H,W)
    B, _, H, W = flow.shape
    flow_t = jnp.transpose(flow, (0, 2, 3, 1))
    disocc = jnp.clip(_forward_warp_ones(flow_t), 0.0, 1.0)
    disocc_map = disocc > 0.5
    enough = jnp.sum(disocc_map.astype(jnp.float32)) >= (B * H * W / 2.0)
    return jnp.where(enough, disocc_map, jnp.ones_like(disocc_map))


def adaptive_disocc_detection_disp(disp):  # disp (B,1,H,W)
    B, _, H, W = disp.shape
    flow = jnp.concatenate([disp * W, jnp.zeros_like(disp)], axis=1)
    return adaptive_disocc_detection(flow)


def apply_disparity(img, disp):
    B, C, H, W = img.shape
    x_base = jnp.broadcast_to(jnp.linspace(0.0, 1.0, W)[None, None, :], (B, H, W))
    y_base = jnp.broadcast_to(jnp.linspace(0.0, 1.0, H)[None, :, None], (B, H, W))
    flow_field = jnp.stack([x_base + disp[:, 0], y_base], axis=3)
    return grid_sample_bilinear(img, 2.0 * flow_field - 1.0)


def generate_image_left(img, disp):
    return apply_disparity(img, -disp)


def intrinsic_scale(K, sy, sx):
    fx = K[:, 0, 0] * sx
    fy = K[:, 1, 1] * sy
    cx = K[:, 0, 2] * sx
    cy = K[:, 1, 2] * sy
    z = jnp.zeros_like(fx)
    o = jnp.ones_like(fx)
    r1 = jnp.stack([fx, z, cx], axis=1)
    r2 = jnp.stack([z, fy, cy], axis=1)
    r3 = jnp.stack([z, z, o], axis=1)
    return jnp.stack([r1, r2, r3], axis=1)


def disp2depth_kitti(disp, kval):
    depth = kval[:, None, None, None] * 0.54 / (disp + (disp == 0).astype(disp.dtype))
    return jnp.clip(depth, 1e-3, 80.0)


def get_pixelgrid(B, H, W, dtype):
    gx = jnp.broadcast_to(jnp.arange(W, dtype=dtype)[None, None, None, :], (B, 1, H, W))
    gy = jnp.broadcast_to(jnp.arange(H, dtype=dtype)[None, None, :, None], (B, 1, H, W))
    ones = jnp.ones((B, 1, H, W), dtype)
    return jnp.concatenate([gx, gy, ones], axis=1)


def pixel2pts(K, depth):
    B, _, H, W = depth.shape
    grid = get_pixelgrid(B, H, W, depth.dtype)
    pts = jnp.einsum('bij,bjn->bin', jnp.linalg.inv(K),
                     grid.reshape(B, 3, -1)) * depth.reshape(B, 1, -1)
    return pts.reshape(B, 3, H, W), grid


def pixel2pts_ms(K, disp, rel_scale):
    Ks = intrinsic_scale(K, rel_scale[:, 0], rel_scale[:, 1])
    depth = disp2depth_kitti(disp, Ks[:, 0, 0])
    pts, _ = pixel2pts(Ks, depth)
    return pts, Ks


def pts2pixel(pts, K):
    B, _, H, W = pts.shape
    proj = jnp.einsum('bij,bjn->bin', K, pts.reshape(B, 3, -1))
    pix = proj[:, 0:2] / (proj[:, 2:3] + 1e-8)
    return pix.reshape(B, 2, H, W)


def pts2pixel_ms(K, pts, sf, disp_size):
    h, w = disp_size
    sf_s = bilinear_resize_ac(sf, h, w)
    pts_tf = pts + sf_s
    coord = pts2pixel(pts_tf, K)
    ncw = coord[:, 0:1] / (w - 1) * 2.0 - 1.0
    nch = coord[:, 1:2] / (h - 1) * 2.0 - 1.0
    return sf_s, pts_tf, jnp.concatenate([ncw, nch], axis=1)


def project_sceneflow2flow(K, sf, disp):
    B, _, H, W = disp.shape
    depth = disp2depth_kitti(disp, K[:, 0, 0])
    pts, grid = pixel2pts(K, depth)
    sf_s = bilinear_resize_ac(sf, H, W)
    coord = pts2pixel(pts + sf_s, K)
    return coord - grid[:, 0:2]


def reconstruct_img(coord, img):
    grid = jnp.transpose(coord, (0, 2, 3, 1))
    warp, wsum = _bilinear_gather(img, grid)     # single gather pass
    mask = (wsum >= 1.0).astype(img.dtype)
    return warp * mask


# ---------------------------------------------------------------------------
# The loss module (no learnable parameters — only scalar hyper-weights).
# ---------------------------------------------------------------------------
class LossSceneFlowSelfSupNoPts:
    def __init__(self):
        self._weights = list(_WEIGHTS)
        self._ssim_w = _SSIM_W
        self._disp_smooth_w = _DISP_SMOOTH_W
        self._sf_3d_pts = 0.2
        self._sf_3d_sm = _SF_3D_SM

    def _depth_losses(self, disp_l1, disp_l2, disp_r1, disp_r2,
                      img_l1_aug, img_l2_aug, img_r1_aug, img_r2_aug, ii):
        """Both stereo depth losses in ONE fused pallas_call (grid over 2B)."""
        img_r1_warp = generate_image_left(img_r1_aug, disp_l1)
        img_r2_warp = generate_image_left(img_r2_aug, disp_l2)
        occ_l1 = adaptive_disocc_detection_disp(disp_r1)
        occ_l2 = adaptive_disocc_detection_disp(disp_r2)

        B, _, H, W = disp_l1.shape
        a = jnp.concatenate([img_l1_aug, img_l2_aug], axis=0)
        b = jnp.concatenate([img_r1_warp, img_r2_warp], axis=0)
        # TODO(synk): pass occ as uint8 to shave HBM on v5e.
        occ = jnp.concatenate([occ_l1, occ_l2], axis=0).astype(jnp.float32)
        d = jnp.concatenate([disp_l1, disp_l2], axis=0)

        # sweight=None -> the all-ones weight plane is never read from HBM
        p, o, s = fused_photo_smooth_sums(a, b, occ, d, None, self._ssim_w, 10.0)
        denom_sm = float(B * 1 * H * W) * (2.0 ** ii)

        def per_dir(lo, hi):
            loss_img = jnp.sum(p[lo:hi]) / jnp.maximum(jnp.sum(o[lo:hi]), 1.0)
            loss_smooth = jnp.sum(s[lo:hi]) / denom_sm
            return loss_img + self._disp_smooth_w * loss_smooth

        return per_dir(0, B), per_dir(B, 2 * B), occ_l1, occ_l2

    def sceneflow_loss(self, sf_f, sf_b, disp_l1, disp_l2, disp_occ_l1, disp_occ_l2,
                       k_l1_aug, k_l2_aug, img_l1_aug, img_l2_aug, aug_size, ii):
        B, Cs, h_dp, w_dp = sf_f.shape
        disp_l1 = disp_l1 * w_dp
        disp_l2 = disp_l2 * w_dp

        local_scale = jnp.zeros_like(aug_size)
        local_scale = local_scale.at[:, 0].set(h_dp).at[:, 1].set(w_dp)

        pts1, k1_scale = pixel2pts_ms(k_l1_aug, disp_l1, local_scale / aug_size)
        pts2, k2_scale = pixel2pts_ms(k_l2_aug, disp_l2, local_scale / aug_size)

        _, _, coord1 = pts2pixel_ms(k1_scale, pts1, sf_f, [h_dp, w_dp])
        _, _, coord2 = pts2pixel_ms(k2_scale, pts2, sf_b, [h_dp, w_dp])

        flow_f = project_sceneflow2flow(k1_scale, sf_f, disp_l1)
        flow_b = project_sceneflow2flow(k2_scale, sf_b, disp_l2)
        occ_map_b = jnp.logical_and(adaptive_disocc_detection(flow_f), disp_occ_l2)
        occ_map_f = jnp.logical_and(adaptive_disocc_detection(flow_b), disp_occ_l1)

        img_l2_warp = reconstruct_img(coord1, img_l2_aug)
        img_l1_warp = reconstruct_img(coord2, img_l1_aug)

        pts_norm1 = jnp.sqrt(jnp.sum(pts1 * pts1, axis=1, keepdims=True))
        pts_norm2 = jnp.sqrt(jnp.sum(pts2 * pts2, axis=1, keepdims=True))
        inv_n1 = 1.0 / (pts_norm1 + 1e-8)
        inv_n2 = 1.0 / (pts_norm2 + 1e-8)

        # both photometric/smoothness directions in ONE pallas_call (grid 2B)
        a = jnp.concatenate([img_l1_aug, img_l2_aug], axis=0)
        b = jnp.concatenate([img_l2_warp, img_l1_warp], axis=0)
        occ = jnp.concatenate([occ_map_f, occ_map_b], axis=0).astype(jnp.float32)
        sfc = jnp.concatenate([sf_f, sf_b], axis=0)
        sw = jnp.concatenate([inv_n1, inv_n2], axis=0)

        p, o, s = fused_photo_smooth_sums(a, b, occ, sfc, sw, self._ssim_w, 10.0)

        loss_im = (jnp.sum(p[:B]) / jnp.maximum(jnp.sum(o[:B]), 1.0)
                   + jnp.sum(p[B:]) / jnp.maximum(jnp.sum(o[B:]), 1.0))
        denom = float(B * Cs * h_dp * w_dp)
        loss_3d_s = (jnp.sum(s[:B]) / denom + jnp.sum(s[B:]) / denom) / (2.0 ** ii)

        sceneflow_loss = loss_im + self._sf_3d_sm * loss_3d_s
        return sceneflow_loss, loss_im, loss_3d_s

    def forward(self, output_dict, target_dict):
        loss_sf_sum = 0.0
        loss_dp_sum = 0.0
        loss_sf_2d = 0.0
        loss_sf_sm = 0.0

        k_l1_aug = target_dict['input_k_l1_aug']
        k_l2_aug = target_dict['input_k_l2_aug']
        aug_size = target_dict['aug_size']

        disp_r1_dict = output_dict['output_dict_r']['disp_l1']
        disp_r2_dict = output_dict['output_dict_r']['disp_l2']

        for ii, (sf_f, sf_b, disp_l1, disp_l2, disp_r1, disp_r2) in enumerate(
                zip(output_dict['flow_f'], output_dict['flow_b'],
                    output_dict['disp_l1'], output_dict['disp_l2'],
                    disp_r1_dict, disp_r2_dict)):
            h, w = sf_f.shape[2], sf_f.shape[3]
            # TODO(synk): build the image pyramid progressively rather than
            #             resizing from full resolution four times per level.
            img_l1_aug = bilinear_resize_ac(target_dict['input_l1_aug'], h, w)
            img_l2_aug = bilinear_resize_ac(target_dict['input_l2_aug'], h, w)
            img_r1_aug = bilinear_resize_ac(target_dict['input_r1_aug'], h, w)
            img_r2_aug = bilinear_resize_ac(target_dict['input_r2_aug'], h, w)

            loss_disp_l1, loss_disp_l2, disp_occ_l1, disp_occ_l2 = self._depth_losses(
                disp_l1, disp_l2, disp_r1, disp_r2,
                img_l1_aug, img_l2_aug, img_r1_aug, img_r2_aug, ii)
            loss_dp_sum = loss_dp_sum + (loss_disp_l1 + loss_disp_l2) * self._weights[ii]

            loss_sceneflow, loss_im, loss_3d_s = self.sceneflow_loss(
                sf_f, sf_b, disp_l1, disp_l2, disp_occ_l1, disp_occ_l2,
                k_l1_aug, k_l2_aug, img_l1_aug, img_l2_aug, aug_size, ii)
            loss_sf_sum = loss_sf_sum + loss_sceneflow * self._weights[ii]
            loss_sf_2d = loss_sf_2d + loss_im
            loss_sf_sm = loss_sf_sm + loss_3d_s

        f_loss = jax.lax.stop_gradient(loss_sf_sum)
        d_loss = jax.lax.stop_gradient(loss_dp_sum)
        max_val = jnp.maximum(f_loss, d_loss)
        # guard the degenerate zero-loss case (reference would produce inf/NaN)
        f_weight = max_val / jnp.where(f_loss == 0, 1.0, f_loss)
        d_weight = max_val / jnp.where(d_loss == 0, 1.0, d_loss)
        total_loss = loss_sf_sum * f_weight + loss_dp_sum * d_weight

        # detaching_grad_of_outputs is an in-place autograd detach — no-op in JAX.
        return {'dp': loss_dp_sum, 'sf': loss_sf_sum, 's_2': loss_sf_2d,
                's_3s': loss_sf_sm, 'total_loss': total_loss}


if __name__ == "__main__":
    key = jax.random.PRNGKey(0)
    B, C, H, W = 2, 3, 16, 16       # pyramid-level resolution
    AH, AW = 32, 32                 # "augmented" full-image resolution
    keys = jax.random.split(key, 12)

    K_mat = jnp.broadcast_to(jnp.array([[30.0, 0.0, 16.0],
                                        [0.0, 30.0, 16.0],
                                        [0.0, 0.0, 1.0]], jnp.float32), (B, 3, 3))

    target_dict = {
        'input_l1': jax.random.uniform(keys[0], (B, C, AH, AW), jnp.float32),
        'input_l1_aug': jax.random.uniform(keys[0], (B, C, AH, AW), jnp.float32),
        'input_l2_aug': jax.random.uniform(keys[1], (B, C, AH, AW), jnp.float32),
        'input_r1_aug': jax.random.uniform(keys[2], (B, C, AH, AW), jnp.float32),
        'input_r2_aug': jax.random.uniform(keys[3], (B, C, AH, AW), jnp.float32),
        'input_k_l1_aug': K_mat,
        'input_k_l2_aug': K_mat,
        'aug_size': jnp.broadcast_to(jnp.array([float(AH), float(AW)], jnp.float32), (B, 2)),
    }

    def rand_disp(k):
        return jax.random.uniform(k, (B, 1, H, W), jnp.float32, 0.02, 0.3)

    output_dict = {
        'flow_f': [0.1 * jax.random.normal(keys[4], (B, 3, H, W), jnp.float32)],
        'flow_b': [0.1 * jax.random.normal(keys[5], (B, 3, H, W), jnp.float32)],
        'disp_l1': [rand_disp(keys[6])],
        'disp_l2': [rand_disp(keys[7])],
        'output_dict_r': {
            'disp_l1': [rand_disp(keys[8])],
            'disp_l2': [rand_disp(keys[9])],
        },
    }

    loss_fn = LossSceneFlowSelfSupNoPts()
    loss_dict = loss_fn.forward(output_dict, target_dict)
    jax.block_until_ready(loss_dict['total_loss'])

    # --- exercise the row-chunked kernel path (used at large H on v7x) and ---
    # --- check it against the single-chunk path on identical inputs.       ---
    kc = jax.random.split(jax.random.PRNGKey(1), 5)
    Bc, Cc, Hc, Wc = 1, 3, 32, 128
    a_c = jax.random.uniform(kc[0], (Bc, Cc, Hc, Wc), jnp.float32)
    b_c = jax.random.uniform(kc[1], (Bc, Cc, Hc, Wc), jnp.float32)
    occ_c = (jax.random.uniform(kc[2], (Bc, 1, Hc, Wc)) > 0.3).astype(jnp.float32)
    sf_c = jax.random.normal(kc[3], (Bc, 3, Hc, Wc), jnp.float32)
    sw_c = jax.random.uniform(kc[4], (Bc, 1, Hc, Wc), jnp.float32, 0.1, 1.0)
    ref = fused_photo_smooth_sums(a_c, b_c, occ_c, sf_c, sw_c, row_tile=Hc)   # 1 chunk
    chk = fused_photo_smooth_sums(a_c, b_c, occ_c, sf_c, sw_c, row_tile=8)    # 4 chunks
    jax.block_until_ready(chk)
    for r, c in zip(ref, chk):
        assert bool(jnp.allclose(r, c, rtol=1e-3, atol=1e-2)), (r, c)

    print("KERNEL_OK")
</pallas_src>

<mosaic_0001>
module attributes {stable_mosaic.version = 11 : i64} {
  func.func @kernel(%arg0: i32, %arg1: i32, %arg2: memref<1x3x16x16xf32, #tpu.memory_space<vmem>>, %arg3: memref<1x3x16x16xf32, #tpu.memory_space<vmem>>, %arg4: memref<1x1x16x16xf32, #tpu.memory_space<vmem>>, %arg5: memref<1x1x16x16xf32, #tpu.memory_space<vmem>>, %arg6: memref<1x1x128xf32, #tpu.memory_space<vmem>>) attributes {dimension_semantics = [#tpu.dimension_semantics<parallel>, #tpu.dimension_semantics<arbitrary>], iteration_bounds = array<i64: 4, 1>, scalar_prefetch = 0 : i64, scratch_operands = 0 : i64, tpu.core_type = #tpu.core_type<tc>, window_params = [{transform_indices = @transform_0, window_bounds = array<i64: 1, 3, 16, 16>}, {transform_indices = @transform_1, window_bounds = array<i64: 1, 3, 16, 16>}, {transform_indices = @transform_2, window_bounds = array<i64: 1, 1, 16, 16>}, {transform_indices = @transform_3, window_bounds = array<i64: 1, 1, 16, 16>}, {transform_indices = @transform_4, window_bounds = array<i64: 1, 1, 128>}]} {
    %c0_i32 = arith.constant 0 : i32
    %0 = arith.cmpi eq, %arg1, %c0_i32 : i32
    %1 = arith.extui %0 : i1 to i32
    %c0_i32_0 = arith.constant 0 : i32
    %2 = arith.cmpi ne, %1, %c0_i32_0 : i32
    scf.if %2 {
      %cst_94 = arith.constant 0.000000e+00 : f32
      %240 = vector.broadcast %cst_94 : f32 to vector<1x1x128xf32>
      %c0_95 = arith.constant 0 : index
      %c0_96 = arith.constant 0 : index
      %c0_97 = arith.constant 0 : index
      %241 = vector.load %arg6[%c0_95, %c0_96, %c0_97] : memref<1x1x128xf32, #tpu.memory_space<vmem>>, vector<1x1x128xf32>
      tpu.vector_store %arg6[%c0_95, %c0_96, %c0_97], %240 {strides = array<i32>} : memref<1x1x128xf32, #tpu.memory_space<vmem>>, vector<1x1x128xf32>,
    } else {
    }
    %c0 = arith.constant 0 : index
    %c0_1 = arith.constant 0 : index
    %c0_2 = arith.constant 0 : index
    %c0_3 = arith.constant 0 : index
    %3 = vector.load %arg2[%c0, %c0_1, %c0_2, %c0_3] : memref<1x3x16x16xf32, #tpu.memory_space<vmem>>, vector<1x3x16x16xf32>
    %4 = vector.shape_cast %3 : vector<1x3x16x16xf32> to vector<3x16x16xf32>
    %c0_4 = arith.constant 0 : index
    %c0_5 = arith.constant 0 : index
    %c0_6 = arith.constant 0 : index
    %c0_7 = arith.constant 0 : index
    %5 = vector.load %arg3[%c0_4, %c0_5, %c0_6, %c0_7] : memref<1x3x16x16xf32, #tpu.memory_space<vmem>>, vector<1x3x16x16xf32>
    %6 = vector.shape_cast %5 : vector<1x3x16x16xf32> to vector<3x16x16xf32>
    %c0_8 = arith.constant 0 : index
    %c0_9 = arith.constant 0 : index
    %c0_10 = arith.constant 0 : index
    %c0_11 = arith.constant 0 : index
    %7 = vector.load %arg4[%c0_8, %c0_9, %c0_10, %c0_11] : memref<1x1x16x16xf32, #tpu.memory_space<vmem>>, vector<1x1x16x16xf32>
    %8 = vector.shape_cast %7 : vector<1x1x16x16xf32> to vector<16x16xf32>
    %c0_12 = arith.constant 0 : index
    %c0_13 = arith.constant 0 : index
    %c0_14 = arith.constant 0 : index
    %c0_15 = arith.constant 0 : index
    %9 = vector.load %arg5[%c0_12, %c0_13, %c0_14, %c0_15] : memref<1x1x16x16xf32, #tpu.memory_space<vmem>>, vector<1x1x16x16xf32>
    %10 = vector.shape_cast %9 : vector<1x1x16x16xf32> to vector<1x16x16xf32>
    %11 = tpu.iota {dimensions = array<i32: 0>} : vector<16x16xi32>
    %12 = tpu.iota {dimensions = array<i32: 1>} : vector<16x16xi32>
    %13 = arith.subf %6, %4 : vector<3x16x16xf32>
    %14 = math.absf %13 : vector<3x16x16xf32>
    %cst = arith.constant dense<0.000000e+00> : vector<16x16xf32>
    %15 = vector.multi_reduction <add>, %14, %cst [0] : vector<3x16x16xf32> to vector<16x16xf32>
    %c1_i32 = arith.constant 1 : i32
    %16 = tpu.dynamic_rotate %4 by %c1_i32 dim 2 : vector<3x16x16xf32>, i32 -> vector<3x16x16xf32>
    %17 = arith.addf %16, %4 : vector<3x16x16xf32>
    %c15_i32 = arith.constant 15 : i32
    %18 = tpu.dynamic_rotate %4 by %c15_i32 dim 2 : vector<3x16x16xf32>, i32 -> vector<3x16x16xf32>
    %19 = arith.addf %17, %18 : vector<3x16x16xf32>
    %c1_i32_16 = arith.constant 1 : i32
    %20 = tpu.dynamic_rotate %19 by %c1_i32_16 dim 1 : vector<3x16x16xf32>, i32 -> vector<3x16x16xf32>
    %21 = arith.addf %20, %19 : vector<3x16x16xf32>
    %c15_i32_17 = arith.constant 15 : i32
    %22 = tpu.dynamic_rotate %19 by %c15_i32_17 dim 1 : vector<3x16x16xf32>, i32 -> vector<3x16x16xf32>
    %23 = arith.addf %21, %22 : vector<3x16x16xf32>
    %cst_18 = arith.constant 0.111111112 : f32
    %24 = vector.broadcast %cst_18 : f32 to vector<3x16x16xf32>
    %25 = arith.mulf %23, %24 : vector<3x16x16xf32>
    %c1_i32_19 = arith.constant 1 : i32
    %26 = tpu.dynamic_rotate %6 by %c1_i32_19 dim 2 : vector<3x16x16xf32>, i32 -> vector<3x16x16xf32>
    %27 = arith.addf %26, %6 : vector<3x16x16xf32>
    %c15_i32_20 = arith.constant 15 : i32
    %28 = tpu.dynamic_rotate %6 by %c15_i32_20 dim 2 : vector<3x16x16xf32>, i32 -> vector<3x16x16xf32>
    %29 = arith.addf %27, %28 : vector<3x16x16xf32>
    %c1_i32_21 = arith.constant 1 : i32
    %30 = tpu.dynamic_rotate %29 by %c1_i32_21 dim 1 : vector<3x16x16xf32>, i32 -> vector<3x16x16xf32>
    %31 = arith.addf %30, %29 : vector<3x16x16xf32>
    %c15_i32_22 = arith.constant 15 : i32
    %32 = tpu.dynamic_rotate %29 by %c15_i32_22 dim 1 : vector<3x16x16xf32>, i32 -> vector<3x16x16xf32>
    %33 = arith.addf %31, %32 : vector<3x16x16xf32>
    %cst_23 = arith.constant 0.111111112 : f32
    %34 = vector.broadcast %cst_23 : f32 to vector<3x16x16xf32>
    %35 = arith.mulf %33, %34 : vector<3x16x16xf32>
    %36 = arith.mulf %4, %4 : vector<3x16x16xf32>
    %c1_i32_24 = arith.constant 1 : i32
    %37 = tpu.dynamic_rotate %36 by %c1_i32_24 dim 2 : vector<3x16x16xf32>, i32 -> vector<3x16x16xf32>
    %38 = arith.addf %37, %36 : vector<3x16x16xf32>
    %c15_i32_25 = arith.constant 15 : i32
    %39 = tpu.dynamic_rotate %36 by %c15_i32_25 dim 2 : vector<3x16x16xf32>, i32 -> vector<3x16x16xf32>
    %40 = arith.addf %38, %39 : vector<3x16x16xf32>
    %c1_i32_26 = arith.constant 1 : i32
    %41 = tpu.dynamic_rotate %40 by %c1_i32_26 dim 1 : vector<3x16x16xf32>, i32 -> vector<3x16x16xf32>
    %42 = arith.addf %41, %40 : vector<3x16x16xf32>
    %c15_i32_27 = arith.constant 15 : i32
    %43 = tpu.dynamic_rotate %40 by %c15_i32_27 dim 1 : vector<3x16x16xf32>, i32 -> vector<3x16x16xf32>
    %44 = arith.addf %42, %43 : vector<3x16x16xf32>
    %cst_28 = arith.constant 0.111111112 : f32
    %45 = vector.broadcast %cst_28 : f32 to vector<3x16x16xf32>
    %46 = arith.mulf %44, %45 : vector<3x16x16xf32>
    %47 = arith.mulf %6, %6 : vector<3x16x16xf32>
    %c1_i32_29 = arith.constant 1 : i32
    %48 = tpu.dynamic_rotate %47 by %c1_i32_29 dim 2 : vector<3x16x16xf32>, i32 -> vector<3x16x16xf32>
    %49 = arith.addf %48, %47 : vector<3x16x16xf32>
    %c15_i32_30 = arith.constant 15 : i32
    %50 = tpu.dynamic_rotate %47 by %c15_i32_30 dim 2 : vector<3x16x16xf32>, i32 -> vector<3x16x16xf32>
    %51 = arith.addf %49, %50 : vector<3x16x16xf32>
    %c1_i32_31 = arith.constant 1 : i32
    %52 = tpu.dynamic_rotate %51 by %c1_i32_31 dim 1 : vector<3x16x16xf32>, i32 -> vector<3x16x16xf32>
    %53 = arith.addf %52, %51 : vector<3x16x16xf32>
    %c15_i32_32 = arith.constant 15 : i32
    %54 = tpu.dynamic_rotate %51 by %c15_i32_32 dim 1 : vector<3x16x16xf32>, i32 -> vector<3x16x16xf32>
    %55 = arith.addf %53, %54 : vector<3x16x16xf32>
    %cst_33 = arith.constant 0.111111112 : f32
    %56 = vector.broadcast %cst_33 : f32 to vector<3x16x16xf32>
    %57 = arith.mulf %55, %56 : vector<3x16x16xf32>
    %58 = arith.mulf %4, %6 : vector<3x16x16xf32>
    %c1_i32_34 = arith.constant 1 : i32
    %59 = tpu.dynamic_rotate %58 by %c1_i32_34 dim 2 : vector<3x16x16xf32>, i32 -> vector<3x16x16xf32>
    %60 = arith.addf %59, %58 : vector<3x16x16xf32>
    %c15_i32_35 = arith.constant 15 : i32
    %61 = tpu.dynamic_rotate %58 by %c15_i32_35 dim 2 : vector<3x16x16xf32>, i32 -> vector<3x16x16xf32>
    %62 = arith.addf %60, %61 : vector<3x16x16xf32>
    %c1_i32_36 = arith.constant 1 : i32
    %63 = tpu.dynamic_rotate %62 by %c1_i32_36 dim 1 : vector<3x16x16xf32>, i32 -> vector<3x16x16xf32>
    %64 = arith.addf %63, %62 : vector<3x16x16xf32>
    %c15_i32_37 = arith.constant 15 : i32
    %65 = tpu.dynamic_rotate %62 by %c15_i32_37 dim 1 : vector<3x16x16xf32>, i32 -> vector<3x16x16xf32>
    %66 = arith.addf %64, %65 : vector<3x16x16xf32>
    %cst_38 = arith.constant 0.111111112 : f32
    %67 = vector.broadcast %cst_38 : f32 to vector<3x16x16xf32>
    %68 = arith.mulf %66, %67 : vector<3x16x16xf32>
    %69 = arith.mulf %25, %35 : vector<3x16x16xf32>
    %70 = arith.mulf %25, %25 : vector<3x16x16xf32>
    %71 = arith.mulf %35, %35 : vector<3x16x16xf32>
    %72 = arith.subf %46, %70 : vector<3x16x16xf32>
    %73 = arith.subf %57, %71 : vector<3x16x16xf32>
    %74 = arith.subf %68, %69 : vector<3x16x16xf32>
    %cst_39 = arith.constant 2.000000e+00 : f32
    %75 = vector.broadcast %cst_39 : f32 to vector<3x16x16xf32>
    %76 = arith.mulf %75, %69 : vector<3x16x16xf32>
    %cst_40 = arith.constant 9.99999974E-5 : f32
    %77 = vector.broadcast %cst_40 : f32 to vector<3x16x16xf32>
    %78 = arith.addf %76, %77 : vector<3x16x16xf32>
    %cst_41 = arith.constant 2.000000e+00 : f32
    %79 = vector.broadcast %cst_41 : f32 to vector<3x16x16xf32>
    %80 = arith.mulf %79, %74 : vector<3x16x16xf32>
    %cst_42 = arith.constant 8.99999984E-4 : f32
    %81 = vector.broadcast %cst_42 : f32 to vector<3x16x16xf32>
    %82 = arith.addf %80, %81 : vector<3x16x16xf32>
    %83 = arith.mulf %78, %82 : vector<3x16x16xf32>
    %84 = arith.addf %70, %71 : vector<3x16x16xf32>
    %cst_43 = arith.constant 9.99999974E-5 : f32
    %85 = vector.broadcast %cst_43 : f32 to vector<3x16x16xf32>
    %86 = arith.addf %84, %85 : vector<3x16x16xf32>
    %87 = arith.addf %72, %73 : vector<3x16x16xf32>
    %cst_44 = arith.constant 8.99999984E-4 : f32
    %88 = vector.broadcast %cst_44 : f32 to vector<3x16x16xf32>
    %89 = arith.addf %87, %88 : vector<3x16x16xf32>
    %90 = arith.mulf %86, %89 : vector<3x16x16xf32>
    %91 = arith.divf %83, %90 : vector<3x16x16xf32>
    %cst_45 = arith.constant 1.000000e+00 : f32
    %92 = vector.broadcast %cst_45 : f32 to vector<3x16x16xf32>
    %93 = arith.subf %92, %91 : vector<3x16x16xf32>
    %cst_46 = arith.constant 5.000000e-01 : f32
    %94 = vector.broadcast %cst_46 : f32 to vector<3x16x16xf32>
    %95 = arith.mulf %93, %94 : vector<3x16x16xf32>
    %cst_47 = arith.constant 0.000000e+00 : f32
    %cst_48 = arith.constant 1.000000e+00 : f32
    %96 = vector.broadcast %cst_47 : f32 to vector<3x16x16xf32>
    %97 = arith.maximumf %96, %95 : vector<3x16x16xf32>
    %98 = vector.broadcast %cst_48 : f32 to vector<3x16x16xf32>
    %99 = arith.minimumf %98, %97 : vector<3x16x16xf32>
    %cst_49 = arith.constant dense<0.000000e+00> : vector<16x16xf32>
    %100 = vector.multi_reduction <add>, %99, %cst_49 [0] : vector<3x16x16xf32> to vector<16x16xf32>
    %cst_50 = arith.constant 3.000000e+00 : f32
    %101 = vector.broadcast %cst_50 : f32 to vector<16x16xf32>
    %102 = arith.divf %100, %101 : vector<16x16xf32>
    %c1_i32_51 = arith.constant 1 : i32
    %103 = vector.broadcast %c1_i32_51 : i32 to vector<16x16xi32>
    %104 = arith.cmpi sge, %11, %103 : vector<16x16xi32>
    %c14_i32 = arith.constant 14 : i32
    %105 = vector.broadcast %c14_i32 : i32 to vector<16x16xi32>
    %106 = arith.cmpi sle, %11, %105 : vector<16x16xi32>
    %107 = arith.andi %104, %106 : vector<16x16xi1>
    %c1_i32_52 = arith.constant 1 : i32
    %108 = vector.broadcast %c1_i32_52 : i32 to vector<16x16xi32>
    %109 = arith.cmpi sge, %12, %108 : vector<16x16xi32>
    %110 = arith.andi %107, %109 : vector<16x16xi1>
    %c14_i32_53 = arith.constant 14 : i32
    %111 = vector.broadcast %c14_i32_53 : i32 to vector<16x16xi32>
    %112 = arith.cmpi sle, %12, %111 : vector<16x16xi32>
    %113 = arith.andi %110, %112 : vector<16x16xi1>
    %cst_54 = arith.constant 1.500000e-01 : f32
    %114 = vector.broadcast %cst_54 : f32 to vector<16x16xf32>
    %115 = arith.mulf %114, %15 : vector<16x16xf32>
    %cst_55 = arith.constant 0.000000e+00 : f32
    %116 = vector.broadcast %cst_55 : f32 to vector<16x16xf32>
    %117 = arith.select %113, %102, %116 : vector<16x16xi1>, vector<16x16xf32>
    %cst_56 = arith.constant 8.500000e-01 : f32
    %118 = vector.broadcast %cst_56 : f32 to vector<16x16xf32>
    %119 = arith.mulf %118, %117 : vector<16x16xf32>
    %120 = arith.addf %115, %119 : vector<16x16xf32>
    %c15_i32_57 = arith.constant 15 : i32
    %121 = tpu.dynamic_rotate %4 by %c15_i32_57 dim 2 : vector<3x16x16xf32>, i32 -> vector<3x16x16xf32>
    %c15_i32_58 = arith.constant 15 : i32
    %122 = tpu.dynamic_rotate %4 by %c15_i32_58 dim 1 : vector<3x16x16xf32>, i32 -> vector<3x16x16xf32>
    %123 = arith.subf %4, %121 : vector<3x16x16xf32>
    %124 = math.absf %123 : vector<3x16x16xf32>
    %cst_59 = arith.constant dense<0.000000e+00> : vector<16x16xf32>
    %125 = vector.multi_reduction <add>, %124, %cst_59 [0] : vector<3x16x16xf32> to vector<16x16xf32>
    %cst_60 = arith.constant 3.000000e+00 : f32
    %126 = vector.broadcast %cst_60 : f32 to vector<16x16xf32>
    %127 = arith.divf %125, %126 : vector<16x16xf32>
    %cst_61 = arith.constant -1.000000e+01 : f32
    %128 = vector.broadcast %cst_61 : f32 to vector<16x16xf32>
    %129 = arith.mulf %128, %127 : vector<16x16xf32>
    %130 = math.exp %129 : vector<16x16xf32>
    %131 = arith.subf %4, %122 : vector<3x16x16xf32>
    %132 = math.absf %131 : vector<3x16x16xf32>
    %cst_62 = arith.constant dense<0.000000e+00> : vector<16x16xf32>
    %133 = vector.multi_reduction <add>, %132, %cst_62 [0] : vector<3x16x16xf32> to vector<16x16xf32>
    %cst_63 = arith.constant 3.000000e+00 : f32
    %134 = vector.broadcast %cst_63 : f32 to vector<16x16xf32>
    %135 = arith.divf %133, %134 : vector<16x16xf32>
    %cst_64 = arith.constant -1.000000e+01 : f32
    %136 = vector.broadcast %cst_64 : f32 to vector<16x16xf32>
    %137 = arith.mulf %136, %135 : vector<16x16xf32>
    %138 = math.exp %137 : vector<16x16xf32>
    %c15_i32_65 = arith.constant 15 : i32
    %139 = vector.broadcast %c15_i32_65 : i32 to vector<16x16xi32>
    %140 = arith.cmpi eq, %12, %139 : vector<16x16xi32>
    %cst_66 = arith.constant 1.000000e+00 : f32
    %141 = vector.broadcast %cst_66 : f32 to vector<16x16xf32>
    %142 = arith.select %140, %141, %130 : vector<16x16xi1>, vector<16x16xf32>
    %c15_i32_67 = arith.constant 15 : i32
    %143 = vector.broadcast %c15_i32_67 : i32 to vector<16x16xi32>
    %144 = arith.cmpi eq, %11, %143 : vector<16x16xi32>
    %cst_68 = arith.constant 1.000000e+00 : f32
    %145 = vector.broadcast %cst_68 : f32 to vector<16x16xf32>
    %146 = arith.select %144, %145, %138 : vector<16x16xi1>, vector<16x16xf32>
    %c1_i32_69 = arith.constant 1 : i32
    %147 = tpu.dynamic_rotate %10 by %c1_i32_69 dim 2 : vector<1x16x16xf32>, i32 -> vector<1x16x16xf32>
    %c15_i32_70 = arith.constant 15 : i32
    %148 = tpu.dynamic_rotate %10 by %c15_i32_70 dim 2 : vector<1x16x16xf32>, i32 -> vector<1x16x16xf32>
    %149 = arith.addf %147, %148 : vector<1x16x16xf32>
    %c0_i32_71 = arith.constant 0 : i32
    %150 = vector.broadcast %c0_i32_71 : i32 to vector<16x16xi32>
    %151 = arith.cmpi eq, %12, %150 : vector<16x16xi32>
    %152 = vector.extract_strided_slice %10 {offsets = [0, 0, 0], sizes = [1, 16, 1], strides = [1, 1, 1]} : vector<1x16x16xf32> to vector<1x16x1xf32>
    %153 = vector.extract_strided_slice %10 {offsets = [0, 0, 1], sizes = [1, 16, 1], strides = [1, 1, 1]} : vector<1x16x16xf32> to vector<1x16x1xf32>
    %154 = arith.addf %152, %153 : vector<1x16x1xf32>
    %155 = vector.shape_cast %151 : vector<16x16xi1> to vector<1x16x16xi1>
    %156 = vector.shape_cast %154 : vector<1x16x1xf32> to vector<1x16x1xf32>
    %157 = vector.broadcast %156 : vector<1x16x1xf32> to vector<1x16x16xf32>
    %158 = arith.select %155, %157, %149 : vector<1x16x16xi1>, vector<1x16x16xf32>
    %c15_i32_72 = arith.constant 15 : i32
    %159 = vector.broadcast %c15_i32_72 : i32 to vector<16x16xi32>
    %160 = arith.cmpi eq, %12, %159 : vector<16x16xi32>
    %161 = vector.extract_strided_slice %10 {offsets = [0, 0, 14], sizes = [1, 16, 1], strides = [1, 1, 1]} : vector<1x16x16xf32> to vector<1x16x1xf32>
    %162 = vector.extract_strided_slice %10 {offsets = [0, 0, 15], sizes = [1, 16, 1], strides = [1, 1, 1]} : vector<1x16x16xf32> to vector<1x16x1xf32>
    %163 = arith.addf %161, %162 : vector<1x16x1xf32>
    %164 = vector.shape_cast %160 : vector<16x16xi1> to vector<1x16x16xi1>
    %165 = vector.shape_cast %163 : vector<1x16x1xf32> to vector<1x16x1xf32>
    %166 = vector.broadcast %165 : vector<1x16x1xf32> to vector<1x16x16xf32>
    %167 = arith.select %164, %166, %158 : vector<1x16x16xi1>, vector<1x16x16xf32>
    %cst_73 = arith.constant 2.000000e+00 : f32
    %168 = vector.broadcast %cst_73 : f32 to vector<1x16x16xf32>
    %169 = arith.mulf %168, %10 : vector<1x16x16xf32>
    %170 = arith.subf %167, %169 : vector<1x16x16xf32>
    %c1_i32_74 = arith.constant 1 : i32
    %171 = tpu.dynamic_rotate %10 by %c1_i32_74 dim 1 : vector<1x16x16xf32>, i32 -> vector<1x16x16xf32>
    %c15_i32_75 = arith.constant 15 : i32
    %172 = tpu.dynamic_rotate %10 by %c15_i32_75 dim 1 : vector<1x16x16xf32>, i32 -> vector<1x16x16xf32>
    %173 = arith.addf %171, %172 : vector<1x16x16xf32>
    %c0_i32_76 = arith.constant 0 : i32
    %174 = vector.broadcast %c0_i32_76 : i32 to vector<16x16xi32>
    %175 = arith.cmpi eq, %11, %174 : vector<16x16xi32>
    %176 = vector.extract_strided_slice %10 {offsets = [0, 0, 0], sizes = [1, 1, 16], strides = [1, 1, 1]} : vector<1x16x16xf32> to vector<1x1x16xf32>
    %177 = vector.extract_strided_slice %10 {offsets = [0, 1, 0], sizes = [1, 1, 16], strides = [1, 1, 1]} : vector<1x16x16xf32> to vector<1x1x16xf32>
    %178 = arith.addf %176, %177 : vector<1x1x16xf32>
    %179 = vector.shape_cast %175 : vector<16x16xi1> to vector<1x16x16xi1>
    %180 = vector.shape_cast %178 : vector<1x1x16xf32> to vector<1x1x16xf32>
    %181 = vector.broadcast %180 : vector<1x1x16xf32> to vector<1x16x16xf32>
    %182 = arith.select %179, %181, %173 : vector<1x16x16xi1>, vector<1x16x16xf32>
    %c15_i32_77 = arith.constant 15 : i32
    %183 = vector.broadcast %c15_i32_77 : i32 to vector<16x16xi32>
    %184 = arith.cmpi eq, %11, %183 : vector<16x16xi32>
    %185 = vector.extract_strided_slice %10 {offsets = [0, 14, 0], sizes = [1, 1, 16], strides = [1, 1, 1]} : vector<1x16x16xf32> to vector<1x1x16xf32>
    %186 = vector.extract_strided_slice %10 {offsets = [0, 15, 0], sizes = [1, 1, 16], strides = [1, 1, 1]} : vector<1x16x16xf32> to vector<1x1x16xf32>
    %187 = arith.addf %185, %186 : vector<1x1x16xf32>
    %188 = vector.shape_cast %184 : vector<16x16xi1> to vector<1x16x16xi1>
    %189 = vector.shape_cast %187 : vector<1x1x16xf32> to vector<1x1x16xf32>
    %190 = vector.broadcast %189 : vector<1x1x16xf32> to vector<1x16x16xf32>
    %191 = arith.select %188, %190, %182 : vector<1x16x16xi1>, vector<1x16x16xf32>
    %cst_78 = arith.constant 2.000000e+00 : f32
    %192 = vector.broadcast %cst_78 : f32 to vector<1x16x16xf32>
    %193 = arith.mulf %192, %10 : vector<1x16x16xf32>
    %194 = arith.subf %191, %193 : vector<1x16x16xf32>
    %195 = math.absf %170 : vector<1x16x16xf32>
    %196 = vector.shape_cast %142 : vector<16x16xf32> to vector<1x16x16xf32>
    %197 = arith.mulf %195, %196 : vector<1x16x16xf32>
    %198 = math.absf %194 : vector<1x16x16xf32>
    %199 = vector.shape_cast %146 : vector<16x16xf32> to vector<1x16x16xf32>
    %200 = arith.mulf %198, %199 : vector<1x16x16xf32>
    %201 = arith.addf %197, %200 : vector<1x16x16xf32>
    %cst_79 = arith.constant dense<0.000000e+00> : vector<16x16xf32>
    %202 = vector.multi_reduction <add>, %201, %cst_79 [0] : vector<1x16x16xf32> to vector<16x16xf32>
    %203 = arith.mulf %120, %8 : vector<16x16xf32>
    %204 = vector.shape_cast %203 : vector<16x16xf32> to vector<1x16x16xf32>
    %cst_80 = arith.constant dense<0.000000e+00> : vector<1xf32>
    %205 = vector.multi_reduction <add>, %204, %cst_80 [1, 2] : vector<1x16x16xf32> to vector<1xf32>
    %206 = vector.shape_cast %205 : vector<1xf32> to vector<1x1x1xf32>
    %207 = vector.extract %206[0, 0, 0] : f32 from vector<1x1x1xf32>
    %208 = vector.shape_cast %8 : vector<16x16xf32> to vector<1x16x16xf32>
    %cst_81 = arith.constant dense<0.000000e+00> : vector<1xf32>
    %209 = vector.multi_reduction <add>, %208, %cst_81 [1, 2] : vector<1x16x16xf32> to vector<1xf32>
    %210 = vector.shape_cast %209 : vector<1xf32> to vector<1x1x1xf32>
    %211 = vector.extract %210[0, 0, 0] : f32 from vector<1x1x1xf32>
    %212 = vector.shape_cast %202 : vector<16x16xf32> to vector<1x16x16xf32>
    %cst_82 = arith.constant dense<0.000000e+00> : vector<1xf32>
    %213 = vector.multi_reduction <add>, %212, %cst_82 [1, 2] : vector<1x16x16xf32> to vector<1xf32>
    %214 = vector.shape_cast %213 : vector<1xf32> to vector<1x1x1xf32>
    %215 = vector.extract %214[0, 0, 0] : f32 from vector<1x1x1xf32>
    %216 = tpu.iota {dimensions = array<i32: 1>} : vector<1x128xi32>
    %c0_i32_83 = arith.constant 0 : i32
    %217 = vector.broadcast %c0_i32_83 : i32 to vector<1x128xi32>
    %218 = arith.cmpi eq, %216, %217 : vector<1x128xi32>
    %cst_84 = arith.constant 0.000000e+00 : f32
    %219 = vector.broadcast %207 : f32 to vector<1x128xf32>
    %220 = vector.broadcast %cst_84 : f32 to vector<1x128xf32>
    %221 = arith.select %218, %219, %220 : vector<1x128xi1>, vector<1x128xf32>
    %c1_i32_85 = arith.constant 1 : i32
    %222 = vector.broadcast %c1_i32_85 : i32 to vector<1x128xi32>
    %223 = arith.cmpi eq, %216, %222 : vector<1x128xi32>
    %cst_86 = arith.constant 0.000000e+00 : f32
    %224 = vector.broadcast %211 : f32 to vector<1x128xf32>
    %225 = vector.broadcast %cst_86 : f32 to vector<1x128xf32>
    %226 = arith.select %223, %224, %225 : vector<1x128xi1>, vector<1x128xf32>
    %227 = arith.addf %221, %226 : vector<1x128xf32>
    %c2_i32 = arith.constant 2 : i32
    %228 = vector.broadcast %c2_i32 : i32 to vector<1x128xi32>
    %229 = arith.cmpi eq, %216, %228 : vector<1x128xi32>
    %cst_87 = arith.constant 0.000000e+00 : f32
    %230 = vector.broadcast %215 : f32 to vector<1x128xf32>
    %231 = vector.broadcast %cst_87 : f32 to vector<1x128xf32>
    %232 = arith.select %229, %230, %231 : vector<1x128xi1>, vector<1x128xf32>
    %233 = arith.addf %227, %232 : vector<1x128xf32>
    %c0_88 = arith.constant 0 : index
    %c0_89 = arith.constant 0 : index
    %c0_90 = arith.constant 0 : index
    %234 = vector.load %arg6[%c0_88, %c0_89, %c0_90] : memref<1x1x128xf32, #tpu.memory_space<vmem>>, vector<1x1x128xf32>
    %235 = vector.shape_cast %234 : vector<1x1x128xf32> to vector<1x128xf32>
    %236 = arith.addf %235, %233 : vector<1x128xf32>
    %c0_91 = arith.constant 0 : index
    %c0_92 = arith.constant 0 : index
    %c0_93 = arith.constant 0 : index
    %237 = vector.load %arg6[%c0_91, %c0_92, %c0_93] : memref<1x1x128xf32, #tpu.memory_space<vmem>>, vector<1x1x128xf32>
    %238 = vector.shape_cast %237 : vector<1x1x128xf32> to vector<1x128xf32>
    %239 = vector.shape_cast %236 : vector<1x128xf32> to vector<1x1x128xf32>
    tpu.vector_store %arg6[%c0_91, %c0_92, %c0_93], %239 {strides = array<i32>} : memref<1x1x128xf32, #tpu.memory_space<vmem>>, vector<1x1x128xf32>,
    return
  }
  func.func @transform_0(%arg0: i32, %arg1: i32) -> (i32, i32, i32, i32) {
    %c0_i32 = arith.constant 0 : i32
    %c0_i32_0 = arith.constant 0 : i32
    %c0_i32_1 = arith.constant 0 : i32
    %c0_i32_2 = arith.constant 0 : i32
    return %arg0, %c0_i32, %c0_i32_0, %c0_i32_1 : i32, i32, i32, i32
  }
  func.func @transform_1(%arg0: i32, %arg1: i32) -> (i32, i32, i32, i32) {
    %c0_i32 = arith.constant 0 : i32
    %c0_i32_0 = arith.constant 0 : i32
    %c0_i32_1 = arith.constant 0 : i32
    %c0_i32_2 = arith.constant 0 : i32
    return %arg0, %c0_i32, %c0_i32_0, %c0_i32_1 : i32, i32, i32, i32
  }
  func.func @transform_2(%arg0: i32, %arg1: i32) -> (i32, i32, i32, i32) {
    %c0_i32 = arith.constant 0 : i32
    %c0_i32_0 = arith.constant 0 : i32
    %c0_i32_1 = arith.constant 0 : i32
    %c0_i32_2 = arith.constant 0 : i32
    return %arg0, %c0_i32, %c0_i32_0, %c0_i32_1 : i32, i32, i32, i32
  }
  func.func @transform_3(%arg0: i32, %arg1: i32) -> (i32, i32, i32, i32) {
    %c0_i32 = arith.constant 0 : i32
    %c0_i32_0 = arith.constant 0 : i32
    %c0_i32_1 = arith.constant 0 : i32
    %c0_i32_2 = arith.constant 0 : i32
    return %arg0, %c0_i32, %c0_i32_0, %c0_i32_1 : i32, i32, i32, i32
  }
  func.func @transform_4(%arg0: i32, %arg1: i32) -> (i32, i32, i32) {
    %c0_i32 = arith.constant 0 : i32
    %c0_i32_0 = arith.constant 0 : i32
    %c0_i32_1 = arith.constant 0 : i32
    return %arg0, %c0_i32, %c0_i32_0 : i32, i32, i32
  }
}

</mosaic_0001>

<bundles_post_ra>
// kernel: tpu_custom_call.1
= control target key start
LH: loop header
LB: loop body
LE: loop exit
PB: predicated region body
PF: predicated region fallthrough
CT: control target
= control target key end

     0   :  { %s3636_s0 = inlined_call_operand.hbm [shape: f32[4,3,16,16], index: 0, kind: input, shape index: {}]   ;;  %s3637_s1 = inlined_call_operand.hbm [shape: f32[4,3,16,16], index: 1, kind: input, shape index: {}]   ;;  %s3638_s2 = inlined_call_operand.hbm [shape: f32[4,1,16,16], index: 2, kind: input, shape index: {}]   ;;  %s3639_s3 = inlined_call_operand.hbm [shape: f32[4,1,16,16], index: 3, kind: input, shape index: {}]   ;;  %s3640_s4 = inlined_call_operand.hbm [shape: f32[4,1,128], index: 4, kind: output, shape index: {}]  }
   0x1   :  { %3681 = sst [smem:[#allocation41_spill]] %s3636_s0 }
   0x2   :  { %3682 = sst [smem:[#allocation42_spill]] %s3637_s1 }
   0x3   :  { %9 = vsyncpa [#allocation3], 0 }
   0x4   :  { %11 = vsyncpa [#allocation3 + $0x1], 0 }
   0x5   :  { %12 = vsyncpa [#allocation6], 0 }
   0x6   :  { %14 = vsyncpa [#allocation6 + $0x1], 0 }
   0x7   :  { %15 = vsyncpa [#allocation9], 0 }
   0x8   :  { %17 = vsyncpa [#allocation9 + $0x1], 0 }
   0x9   :  { %18 = vsyncpa [#allocation4], 0 }
   0xa   :  { %20 = vsyncpa [#allocation4 + $0x1], 0  ;;  %s2202_s15 = smov 0   ;;  %s2204_s16 = smov 0  }
   0xb   :  { %s2206_s17 = smov 0   ;;  %s2208_s18 = smov 0  }
   0xc   :  { %s2210_s19 = smov 0   ;;  %s2212_s20 = smov 0  }
   0xd LB: > { %s2233_s21 = sadd.s32 4294967295, %s2160_s20   ;;  %s1802_s22 = sadd.s32 4294967294, %s2160_s20   ;;  %s2160_s20 = sphi %s2212_s20, %s26_s20   ;;  %s2156_s19 = sphi %s2210_s19, %s3774_s19   ;;  %s2152_s18 = sphi %s2208_s18, %s3773_s18   ;;  %s2148_s17 = sphi %s2206_s17, %s3772_s17   ;;  %s2144_s16 = sphi %s2204_s16, %s3771_s16   ;;  %s2140_s15 = sphi %s2202_s15, %s3770_s15  }
   0xe   : > { %s38_s23 = sadd.s32 1, %s2156_s19  ;;  %s45_s24 = sadd.s32 1, %s2148_s17 }
   0xf   : > { %p40_p0 = scmp.ge.s32.totalorder %s38_s23, 4  ;;  %p52_p1 = scmp.ne.s32.totalorder %s2148_s17, %s2144_s16 }
  0x10   : > { %p53_p2 = scmp.eq.s32.totalorder %s2160_s20, 0  ;;  %p58_p3 = scmp.ne.s32.totalorder %s2144_s16, %s2140_s15 }
  0x11   : > { %s3776_s23 = smov (%p40_p0, %s38_s23), 0  ;;  %p59_p5 = scmp.eq.s32.totalorder %s2233_s21, 0 }
  0x12   : > { %3683 = sst [smem:[#allocation15_spill]] %s3776_s23  ;;  %p2245_p4 = por %p53_p2, %p52_p1 }
  0x13   : > { %s42_s26 = ssub.s32 %s2156_s19, %s3776_s23  ;;  %p160_p6 = scmp.eq.s32.totalorder %s2233_s21, 3 }
  0x14   : > { %p43_p7 = scmp.eq.s32.totalorder %s42_s26, 0  ;;  %p2253_p8 = por %p59_p5, %p58_p3 }
  0x15   : > { %p2257_p9 = por %p160_p6, %p52_p1  ;;  %p166_p10 = scmp.eq.s32.totalorder %s1802_s22, 3 }
  0x16   : > { %s3685_s27 = scalar_select %p2253_p8, 1, 0 }
  0x17   : > { %s3686_s28 = scalar_select %p2257_p9, 1, 0 }
  0x18   : > { %s2262_s29 = scalar_select %p43_p7, %s2148_s17, %s45_s24  }
  0x19   : > { %p2264_p11 = por %p166_p10, %p58_p3  ;;  %p1859_p12 = scmp.lt.s32.totalorder %s2160_s20, 4 }
  0x1a   : > { %3687 = sst [smem:[#allocation16_spill]] %s2262_s29  ;;  %s2270_s5 = sand.u32 1, %s2148_s17  }
  0x1b   : > { %s3688_s30 = scalar_select %p2264_p11, 1, 0 }
  0x1c   : > { %s3641_s6 = smul.u32 48, %s2270_s5  ;;  %p2276_p13 = pnand %p1859_p12, %p2245_p4 }
  0x1d   : > { %s1822_s7 = smul.u32 768, %s2156_s19  ;;  %s207_s9 = sand.u32 1, %s2160_s20  }
  0x1e   : > { %s3690_s1 = sld [smem:[#allocation42_spill]]  ;;  %s211_s13 = scalar_lea.vmem [#allocation5], %s3641_s6 }
  0x1f   : > { %s218_s14 = sshll.u32 %s211_s13, 4  ;;  %s2294_s22 = scalar_lea.sflag [#allocation6], %s207_s9  ;;  %s2291_s14 = int_to_ptr.vmem [resolvable:$true] %s218_s14 }
  0x20   : > { %p2300_p3 = pneg %p2276_p13 }
  0x24   : > { %s2286_s12 = scalar_lea.hbm %s3690_s1, %s1822_s7  ;;  %s1955_s11 = scalar_lea.hbm %s3690_s1, 3072 }
  0x25   : > { %s1950_s24 = scalar_lea.hbm %s2286_s12, 768  ;;  %p1956_p6 = scmp.lt.u32.totalorder %s2286_s12, %s3690_s1 }
  0x26   : > { %p1951_p2 = scmp.ne.s32.totalorder %s2286_s12, %s1950_s24  ;;  %p1957_p7 = scmp.lt.u32.totalorder %s1955_s11, %s1950_s24 }
  0x27   : > { %p1959_p12 = scmp.lt.u32.totalorder %s1950_s24, %s2286_s12 }
  0x28   : > { %p1953_p4 = pnand %p2300_p3, %p1951_p2  ;;  %p1958_p10 = por %p1957_p7, %p1956_p6 }
  0x2a   : > { %p1954_p5 = pneg %p1953_p4  ;;  %p1960_p0 = por %p1959_p12, %p1958_p10 }
  0x2c   : > { %p1961_p1 = pnand %p1960_p0, %p1954_p5 }
  0x2e   : > { %1964 = shalt.err (!%p1961_p1)
}
  0x2f   : > { %s1965_s9 = scalar_lea.vmem %s2291_s14, 768  ;;  %s2162_s26 = smov [#allocation5]  }
  0x30   : > { %p1966_p2 = scmp.ne.s32.totalorder %s2291_s14, %s1965_s9  ;;  %s1970_s10 = sshll.u32 %s2162_s26, 4  ;;  %s1971_s10 = int_to_ptr.vmem [resolvable:$false] %s1970_s10 }
  0x31   : > { %s1972_s6 = scalar_lea.vmem %s1971_s10, 1536  ;;  %p1973_p9 = scmp.lt.s32.totalorder %s2291_s14, %s1971_s10 }
  0x32   : > { %p1968_p4 = pnand %p1966_p2, %p2300_p3  ;;  %p1974_p8 = scmp.lt.s32.totalorder %s1972_s6, %s1965_s9 }
  0x34   : > { %p1969_p11 = pneg %p1968_p4  ;;  %p1975_p6 = por %p1974_p8, %p1973_p9 }
  0x36   : > { %p1976_p7 = pnand %p1975_p6, %p1969_p11 }
  0x38   : > { %1979 = shalt.err (!%p1976_p7)
}
  0x39   : > { %s3645_s24 = smov 128   ;;  %s3647_s11 = smov 8  }
  0x3a   : > { %1848 = dma.hbm_to_vmem [thread:$0]  (!%p2276_p13), %s2286_s12, 768, %s2291_s14, %s2294_s22, %s3645_s24, %s3645_s24, %s3647_s11  }
  0x3b   : > { %p3692_p8 = scmp.lt.s32.totalorder %s2160_s20, 5  ;;  %p3693_p9 = scmp.ge.s32.totalorder %s2160_s20, 1 }
  0x3c   : > { %s3695_s0 = sld [smem:[#allocation41_spill]]  ;;  %s3696_s6 = smul.u32 48, %s2270_s5 }
  0x3d   : > { %p2331_p11 = pnand %p3693_p9, %p3692_p8  ;;  %s3649_s12 = sshll.u32 %s2270_s5, 4 }
  0x3e   : > { %s190_s1 = scalar_lea.vmem [#allocation2], %s3696_s6  ;;  %s187_s14 = scalar_lea.sflag [#allocation3], %s2270_s5 }
  0x3f   : > { %s3694_s13 = scalar_select %p2331_p11, 1, 0 }
  0x40   : > { %s197_s23 = sshll.u32 %s190_s1, 4  ;;  %s2345_s23 = int_to_ptr.vmem [resolvable:$true] %s197_s23 }
  0x42   : > { %s2340_s10 = scalar_lea.hbm %s3695_s0, %s1822_s7  ;;  %s1985_s7 = scalar_lea.hbm %s3695_s0, 3072 }
  0x43   : > { %s1980_s24 = scalar_lea.hbm %s2340_s10, 768  ;;  %p1986_p10 = scmp.lt.u32.totalorder %s2340_s10, %s3695_s0 }
  0x44   : > { %p1981_p0 = scmp.ne.s32.totalorder %s2340_s10, %s1980_s24  ;;  %p1987_p12 = scmp.lt.u32.totalorder %s1985_s7, %s1980_s24 }
  0x45   : > { %p1989_p4 = scmp.lt.u32.totalorder %s1980_s24, %s2340_s10 }
  0x46   : > { %p1983_p1 = pnand %p1981_p0, %p2300_p3  ;;  %p1988_p2 = por %p1987_p12, %p1986_p10 }
  0x48   : > { %p1984_p5 = pneg %p1983_p1  ;;  %p1990_p6 = por %p1989_p4, %p1988_p2 }
  0x4a   : > { %p1991_p7 = pnand %p1990_p6, %p1984_p5 }
  0x4c   : > { %1994 = shalt.err (!%p1991_p7)
}
  0x4d   : > { %s1995_s1 = scalar_lea.vmem %s2345_s23, 768  ;;  %s2165_s11 = smov [#allocation2]  }
  0x4e   : > { %p1996_p8 = scmp.ne.s32.totalorder %s2345_s23, %s1995_s1  ;;  %s2000_s6 = sshll.u32 %s2165_s11, 4  ;;  %s2001_s6 = int_to_ptr.vmem [resolvable:$false] %s2000_s6 }
  0x4f   : > { %s2002_s29 = scalar_lea.vmem %s2001_s6, 1536  ;;  %p2003_p1 = scmp.lt.s32.totalorder %s2345_s23, %s2001_s6 }
  0x50   : > { %p1998_p9 = pnand %p1996_p8, %p2300_p3  ;;  %p2004_p11 = scmp.lt.s32.totalorder %s2002_s29, %s1995_s1 }
  0x52   : > { %p1999_p0 = pneg %p1998_p9  ;;  %p2005_p10 = por %p2004_p11, %p2003_p1 }
  0x54   : > { %p2006_p12 = pnand %p2005_p10, %p1999_p0 }
  0x56   : > { %2009 = shalt.err (!%p2006_p12)
}
  0x57   : > { %s3697_s24 = smov 8   ;;  %s3698_s9 = smov 128  }
  0x58   : > { %1845 = dma.hbm_to_vmem [thread:$0]  (!%p2276_p13), %s2340_s10, 768, %s2345_s23, %s187_s14, %s3698_s9, %s3698_s9, %s3697_s24  }
  0x59   : > { %s1819_s7 = sshll.u32 %s2156_s19, 8  ;;  %s232_s26 = scalar_lea.vmem [#allocation7], %s3649_s12 }
  0x5a   : > { %s239_s1 = sshll.u32 %s232_s26, 4  ;;  %s2382_s29 = scalar_lea.hbm %s3638_s2, %s1819_s7  ;;  %s2384_s1 = int_to_ptr.vmem [resolvable:$true] %s239_s1 }
  0x5b   : > { %s2010_s0 = scalar_lea.hbm %s2382_s29, 256  ;;  %s2015_s14 = scalar_lea.hbm %s3638_s2, 1024 }
  0x5c   : > { %p2011_p11 = scmp.ne.s32.totalorder %s2382_s29, %s2010_s0  ;;  %p2016_p4 = scmp.lt.u32.totalorder %s2382_s29, %s3638_s2 }
  0x5d   : > { %p2017_p6 = scmp.lt.u32.totalorder %s2015_s14, %s2010_s0  ;;  %p2019_p8 = scmp.lt.u32.totalorder %s2010_s0, %s2382_s29 }
  0x5e   : > { %p2013_p5 = pnand %p2011_p11, %p2300_p3 }
  0x5f   : > { %p2018_p7 = por %p2017_p6, %p2016_p4 }
  0x60   : > { %p2014_p2 = pneg %p2013_p5 }
  0x61   : > { %p2020_p9 = por %p2019_p8, %p2018_p7 }
  0x63   : > { %p2021_p0 = pnand %p2020_p9, %p2014_p2 }
  0x65   : > { %2024 = shalt.err (!%p2021_p0)
}
  0x66   : > { %s2025_s11 = scalar_lea.vmem %s2384_s1, 256  ;;  %s2166_s6 = smov [#allocation7]  }
  0x67   : > { %p2026_p1 = scmp.ne.s32.totalorder %s2384_s1, %s2025_s11  ;;  %s2030_s23 = sshll.u32 %s2166_s6, 4  ;;  %s2031_s23 = int_to_ptr.vmem [resolvable:$false] %s2030_s23 }
  0x68   : > { %s2032_s12 = scalar_lea.vmem %s2031_s23, 512  ;;  %p2033_p11 = scmp.lt.s32.totalorder %s2384_s1, %s2031_s23 }
  0x69   : > { %p2028_p10 = pnand %p2026_p1, %p2300_p3  ;;  %p2034_p5 = scmp.lt.s32.totalorder %s2032_s12, %s2025_s11 }
  0x6b   : > { %p2029_p12 = pneg %p2028_p10  ;;  %p2035_p4 = por %p2034_p5, %p2033_p11 }
  0x6d   : > { %p2036_p6 = pnand %p2035_p4, %p2029_p12 }
  0x6f   : > { %2039 = shalt.err (!%p2036_p6)
}
  0x70   : > { %1851 = dma.hbm_to_vmem [thread:$0]  (!%p2276_p13), %s2382_s29, 256, %s2384_s1, %s2294_s22, %s3698_s9, %s3698_s9, %s3697_s24  }
  0x71   : > { %s2416_s14 = scalar_lea.hbm %s3639_s3, %s1819_s7  ;;  %s3699_s26 = sshll.u32 %s2270_s5, 4 }
  0x72   : > { %s253_s11 = scalar_lea.vmem [#allocation8], %s3699_s26  ;;  %s250_s23 = scalar_lea.sflag [#allocation9], %s2270_s5 }
  0x73   : > { %s260_s6 = sshll.u32 %s253_s11, 4  ;;  %s2040_s12 = scalar_lea.hbm %s2416_s14, 256  ;;  %s2420_s6 = int_to_ptr.vmem [resolvable:$true] %s260_s6 }
  0x74   : > { %p2041_p2 = scmp.ne.s32.totalorder %s2416_s14, %s2040_s12  ;;  %s2045_s7 = scalar_lea.hbm %s3639_s3, 1024 }
  0x75   : > { %p2046_p9 = scmp.lt.u32.totalorder %s2416_s14, %s3639_s3  ;;  %p2047_p0 = scmp.lt.u32.totalorder %s2045_s7, %s2040_s12 }
  0x76   : > { %p2043_p7 = pnand %p2041_p2, %p2300_p3  ;;  %p2049_p10 = scmp.lt.u32.totalorder %s2040_s12, %s2416_s14 }
  0x77   : > { %p2048_p1 = por %p2047_p0, %p2046_p9 }
  0x78   : > { %p2044_p8 = pneg %p2043_p7 }
  0x79   : > { %p2050_p12 = por %p2049_p10, %p2048_p1 }
  0x7b   : > { %p2051_p11 = pnand %p2050_p12, %p2044_p8 }
  0x7d   : > { %2054 = shalt.err (!%p2051_p11)
}
  0x7e   : > { %s2055_s10 = scalar_lea.vmem %s2420_s6, 256  ;;  %s2167_s26 = smov [#allocation8]  }
  0x7f   : > { %p2056_p5 = scmp.ne.s32.totalorder %s2420_s6, %s2055_s10  ;;  %s2060_s11 = sshll.u32 %s2167_s26, 4  ;;  %s2061_s11 = int_to_ptr.vmem [resolvable:$false] %s2060_s11 }
  0x80   : > { %s2062_s22 = scalar_lea.vmem %s2061_s11, 512  ;;  %p2063_p2 = scmp.lt.s32.totalorder %s2420_s6, %s2061_s11 }
  0x81   : > { %p2058_p4 = pnand %p2056_p5, %p2300_p3  ;;  %p2064_p7 = scmp.lt.s32.totalorder %s2062_s22, %s2055_s10 }
  0x83   : > { %p2059_p6 = pneg %p2058_p4  ;;  %p2065_p9 = por %p2064_p7, %p2063_p2 }
  0x85   : > { %p2066_p0 = pnand %p2065_p9, %p2059_p6 }
  0x87   : > { %2069 = shalt.err (!%p2066_p0)
}
  0x88   : > { %1854 = dma.hbm_to_vmem [thread:$0]  (!%p2276_p13), %s2416_s14, 256, %s2420_s6, %s250_s23, %s3698_s9, %s3698_s9, %s3697_s24  }
  0x89   : > { %p3700_p3 = scmp.ne.s32.totalorder %s3694_s13, 0 }
  0x8b   : > { %272 = sbr.rel (%p3700_p3) target bundleno = 1010 (0x3f2), region = 36 }
  0x92   : > { %s2452_s25 = sand.u32 1, %s2144_s16   ;;  %p3701_p8 = scmp.ne.s32.totalorder %s3685_s27, 0 }
  0x93   : > { %s1825_s12 = smul.u32 48, %s2452_s25  ;;  %s275_s1 = scalar_lea.sflag [#allocation3], %s2452_s25 }
  0x95   : > { %s2456_s8 = scalar_lea.vmem [#allocation2], %s1825_s12 }
  0x96   : > { %2123 = dma.done.wait (%p3701_p8), %s275_s1, 768  }
  0x97   : > { %2125 = vsyncadd (%p3701_p8), %s275_s1, 4294966528  ;;  %s283_s5 = sand.u32 1, %s2233_s21   ;;  %s2463_s24 = scalar_lea.vmem [#allocation5], %s1825_s12 }
  0x98   : > { %s284_s13 = scalar_lea.sflag [#allocation6], %s283_s5 }
  0x99   : > { %2127 = dma.done.wait (%p3701_p8), %s284_s13, 1024  }
  0x9a   : > { %2129 = vsyncadd (%p3701_p8), %s284_s13, 4294966272  ;;  %s1814_s9 = sshll.u32 %s2452_s25, 4  ;;  %s302_s6 = scalar_lea.sflag [#allocation9], %s2452_s25 }
  0x9b   : > { %s2470_s14 = scalar_lea.vmem [#allocation7], %s1814_s9  ;;  %s2473_s23 = scalar_lea.vmem [#allocation8], %s1814_s9 }
  0x9c   : > { %2131 = dma.done.wait (%p3701_p8), %s302_s6, 256  }
  0x9d   : > { %2133 = vsyncadd (%p3701_p8), %s302_s6, 4294967040  ;;  %v2480_v0 = vld [vmem:[%s2456_s8 + $0x10] sm:$0xff]  ;;  %v2483_v1 = vld [vmem:[%s2456_s8] sm:$0xff]  ;;  %s2168_s21 = smov 16   ;;  %vm393_vm0 = vcmask 1047680   ;;  %s2169_s27 = smov 15  }
  0x9e   : > { %3702 = vst [vmem:[#allocation17_spill] sm:$0xff] %v2480_v0  ;;  %3703 = vst [vmem:[#allocation18_spill] sm:$0xff] %v2483_v1  ;;  %400 = vrot.lane.b32.xlu1 %v2480_v0, %s2168_s21  ;;  %394 = vrot.lane.b32.xlu0 %v2483_v1, %s2168_s21  ;;  %v2490_v2 = vld [vmem:[%s2456_s8 + $0x18] sm:$0xff]  ;;  %v2493_v3 = vld [vmem:[%s2456_s8 + $0x8] sm:$0xff]  ;;  %v2545_v13 = vmul.f32 %v2483_v1, %v2483_v1  ;;  %v2557_v15 = vmul.f32 %v2480_v0, %v2480_v0  ;;  %s2170_s7 = smov 14   ;;  %s2172_s29 = smov 127  }
  0x9f   : > { %3704 = vst [vmem:[#allocation19_spill] sm:$0xff] %v2490_v2  ;;  %3705 = vst [vmem:[#allocation20_spill] sm:$0xff] %v2493_v3  ;;  %v2500_v4 = vld [vmem:[%s2463_s24 + $0x8] sm:$0xff]  ;;  %v2503_v5 = vld [vmem:[%s2463_s24] sm:$0xff]  ;;  %v2541_v12 = vmul.f32 %v2493_v3, %v2493_v3  ;;  %v2553_v14 = vmul.f32 %v2490_v2, %v2490_v2  ;;  %s2173_s0 = smov 113   ;;  %vm382_vm2 = vcmask 130048  }
  0xa0   : > { %3706 = vst [vmem:[#allocation21_spill] sm:$0xff] %v2500_v4  ;;  %3707 = vst [vmem:[#allocation22_spill] sm:$0xff] %v2503_v5  ;;  %v2510_v6 = vld [vmem:[%s2463_s24 + $0x18] sm:$0xff]  ;;  %v2513_v7 = vld [vmem:[%s2463_s24 + $0x10] sm:$0xff]  ;;  %v2565_v16 = vmul.f32 %v2500_v4, %v2500_v4  ;;  %v2569_v17 = vmul.f32 %v2503_v5, %v2503_v5  ;;  %v2613_v24 = vmul.f32 %v2500_v4, %v2493_v3  ;;  %s3574_s10 = scalar_lea.vmem [#allocation10], %s2452_s25  ;;  %s1816_s12 = sshll.u32 %s2152_s18, 4 }
  0xa1   : > { %3708 = vst [vmem:[#allocation23_spill] sm:$0xff] %v2510_v6  ;;  %3709 = vst [vmem:[#allocation24_spill] sm:$0xff] %v2513_v7  ;;  %v2520_v8 = vld [vmem:[%s2456_s8 + $0x28] sm:$0xff]  ;;  %v2523_v9 = vld [vmem:[%s2456_s8 + $0x20] sm:$0xff]  ;;  %v2577_v18 = vmul.f32 %v2510_v6, %v2510_v6  ;;  %v2581_v19 = vmul.f32 %v2513_v7, %v2513_v7  ;;  %v2617_v25 = vmul.f32 %v2503_v5, %v2483_v1  ;;  %s1661_s1 = sshll.u32 %s3574_s10, 4  ;;  %s3587_s13 = scalar_lea.hbm %s3640_s4, %s1816_s12  ;;  %s3589_s1 = int_to_ptr.vmem [resolvable:$true] %s1661_s1 }
  0xa2   : > { %403 = vrot.lane.b32.xlu1 %v2490_v2, %s2168_s21  ;;  %397 = vrot.lane.b32.xlu0 %v2493_v3, %s2168_s21  ;;  %3710 = vst [vmem:[#allocation25_spill] sm:$0xff] %v2520_v8  ;;  %3711 = vst [vmem:[#allocation26_spill] sm:$0xff] %v2523_v9  ;;  %v2530_v10 = vld [vmem:[%s2463_s24 + $0x28] sm:$0xff]  ;;  %v2533_v11 = vld [vmem:[%s2463_s24 + $0x20] sm:$0xff]  ;;  %v2589_v20 = vmul.f32 %v2520_v8, %v2520_v8  ;;  %v2593_v21 = vmul.f32 %v2523_v9, %v2523_v9  ;;  %s1649_s24 = scalar_lea.sflag [#allocation4], %s2452_s25  ;;  %s2070_s9 = scalar_lea.vmem %s3589_s1, 16 }
  0xa3   : > { %3712 = vst [vmem:[#allocation27_spill] sm:$0xff] %v2530_v10  ;;  %3713 = vst [vmem:[#allocation28_spill] sm:$0xff] %v2533_v11  ;;  %v2601_v22 = vmul.f32 %v2530_v10, %v2530_v10  ;;  %v2605_v23 = vmul.f32 %v2533_v11, %v2533_v11  ;;  %v2625_v26 = vmul.f32 %v2510_v6, %v2490_v2  ;;  %v2648_v30 = vld [vmem:[%s2473_s23 + $0x8] sm:$0xff]  ;;  %v2651_v31 = vld [vmem:[%s2473_s23] sm:$0xff]  ;;  %p2071_p13 = scmp.ne.s32.totalorder %s3589_s1, %s2070_s9  ;;  %p3766_p1 = scmp.ne.s32.totalorder %s3686_s28, 0 }
  0xa4   : > { %v2629_v27 = vmul.f32 %v2513_v7, %v2480_v0  ;;  %v2637_v28 = vmul.f32 %v2530_v10, %v2520_v8  ;;  %v2641_v29 = vmul.f32 %v2533_v11, %v2523_v9  ;;  %3714 = vst [vmem:[#allocation29_spill] sm:$0xff] %v2648_v30  ;;  %3715 = vst [vmem:[#allocation30_spill] sm:$0xff] %v2651_v31  ;;  %s2176_s18 = smov [#allocation10]  }
  0xa5   : > { %p2072_p10 = pnand %p2071_p13, %p3766_p1 }
  0xa6   : > { %561 = vrot.lane.b32.xlu1 %v2500_v4, %s2168_s21  ;;  %558 = vrot.lane.b32.xlu0 %v2503_v5, %s2168_s21 }
  0xa7   : > { %p2073_p12 = pneg %p2072_p10 }
  0xaa   : > { %567 = vrot.lane.b32.xlu1 %v2510_v6, %s2168_s21  ;;  %564 = vrot.lane.b32.xlu0 %v2513_v7, %s2168_s21 }
  0xae   : > { %409 = vrot.lane.b32.xlu1 %v2520_v8, %s2168_s21  ;;  %406 = vrot.lane.b32.xlu0 %v2523_v9, %s2168_s21 }
  0xb2   : > { %573 = vrot.lane.b32.xlu1 %v2530_v10, %s2168_s21  ;;  %570 = vrot.lane.b32.xlu0 %v2533_v11, %s2168_s21 }
  0xb6   : > { %729 = vrot.lane.b32.xlu1 %v2541_v12, %s2168_s21  ;;  %726 = vrot.lane.b32.xlu0 %v2545_v13, %s2168_s21 }
  0xba   : > { %735 = vrot.lane.b32.xlu1 %v2553_v14, %s2168_s21  ;;  %732 = vrot.lane.b32.xlu0 %v2557_v15, %s2168_s21 }
  0xbe   : > { %897 = vrot.lane.b32.xlu1 %v2565_v16, %s2168_s21  ;;  %894 = vrot.lane.b32.xlu0 %v2569_v17, %s2168_s21 }
  0xc2   : > { %903 = vrot.lane.b32.xlu1 %v2577_v18, %s2168_s21  ;;  %900 = vrot.lane.b32.xlu0 %v2581_v19, %s2168_s21 }
  0xc6   : > { %741 = vrot.lane.b32.xlu1 %v2589_v20, %s2168_s21  ;;  %738 = vrot.lane.b32.xlu0 %v2593_v21, %s2168_s21 }
  0xca   : > { %909 = vrot.lane.b32.xlu1 %v2601_v22, %s2168_s21  ;;  %906 = vrot.lane.b32.xlu0 %v2605_v23, %s2168_s21 }
  0xce   : > { %1065 = vrot.lane.b32.xlu1 %v2613_v24, %s2168_s21  ;;  %1062 = vrot.lane.b32.xlu0 %v2617_v25, %s2168_s21 }
  0xd2   : > { %1071 = vrot.lane.b32.xlu1 %v2625_v26, %s2168_s21  ;;  %1068 = vrot.lane.b32.xlu0 %v2629_v27, %s2168_s21 }
  0xd6   : > { %1077 = vrot.lane.b32.xlu1 %v2637_v28, %s2168_s21  ;;  %1074 = vrot.lane.b32.xlu0 %v2641_v29, %s2168_s21 }
  0xda   : > { %1489 = vrot.lane.b32.xlu1 %v2648_v30, %s2168_s21  ;;  %1486 = vrot.lane.b32.xlu0 %v2651_v31, %s2168_s21 }
 0x110   : > { %v401_v32 = vpop.permute.xlu1 %400  ;;  %v395_v33 = vpop.permute.xlu0 %394 }
 0x111   : > { %v396_v34 = vsel %vm393_vm0, %v395_v33, %v2483_v1  ;;  %v402_v38 = vsel %vm393_vm0, %v401_v32, %v2480_v0 }
 0x112   : > { %412 = vrot.lane.b32.xlu0 %v396_v34, %s2168_s21 }
 0x114   : > { %v404_v35 = vpop.permute.xlu1 %403  ;;  %v398_v36 = vpop.permute.xlu0 %397 }
 0x115   : > { %v399_v37 = vsel %vm393_vm0, %v398_v36, %v2493_v3  ;;  %v405_v41 = vsel %vm393_vm0, %v404_v35, %v2490_v2 }
 0x116   : > { %414 = vrot.lane.b32.xlu1 %v399_v37, %s2168_s21  ;;  %416 = vrot.lane.b32.xlu0 %v402_v38, %s2168_s21 }
 0x118   : > { %v562_v39 = vpop.permute.xlu1 %561  ;;  %v559_v40 = vpop.permute.xlu0 %558 }
 0x119   : > { %v560_v42 = vsel %vm393_vm0, %v559_v40, %v2503_v5  ;;  %v563_v45 = vsel %vm393_vm0, %v562_v39, %v2500_v4 }
 0x11a   : > { %418 = vrot.lane.b32.xlu1 %v405_v41, %s2168_s21  ;;  %576 = vrot.lane.b32.xlu0 %v560_v42, %s2168_s21 }
 0x11c   : > { %v568_v43 = vpop.permute.xlu1 %567  ;;  %v565_v44 = vpop.permute.xlu0 %564 }
 0x11d   : > { %v566_v46 = vsel %vm393_vm0, %v565_v44, %v2513_v7  ;;  %v569_v49 = vsel %vm393_vm0, %v568_v43, %v2510_v6 }
 0x11e   : > { %578 = vrot.lane.b32.xlu1 %v563_v45, %s2168_s21  ;;  %580 = vrot.lane.b32.xlu0 %v566_v46, %s2168_s21 }
 0x120   : > { %v410_v47 = vpop.permute.xlu1 %409  ;;  %v407_v48 = vpop.permute.xlu0 %406 }
 0x121   : > { %v408_v50 = vsel %vm393_vm0, %v407_v48, %v2523_v9  ;;  %v411_v53 = vsel %vm393_vm0, %v410_v47, %v2520_v8 }
 0x122   : > { %582 = vrot.lane.b32.xlu1 %v569_v49, %s2168_s21  ;;  %420 = vrot.lane.b32.xlu0 %v408_v50, %s2168_s21 }
 0x124   : > { %v574_v51 = vpop.permute.xlu1 %573  ;;  %v571_v52 = vpop.permute.xlu0 %570 }
 0x125   : > { %v572_v54 = vsel %vm393_vm0, %v571_v52, %v2533_v11  ;;  %v575_v57 = vsel %vm393_vm0, %v574_v51, %v2530_v10 }
 0x126   : > { %422 = vrot.lane.b32.xlu1 %v411_v53, %s2168_s21  ;;  %584 = vrot.lane.b32.xlu0 %v572_v54, %s2168_s21 }
 0x128   : > { %v730_v55 = vpop.permute.xlu1 %729  ;;  %v727_v56 = vpop.permute.xlu0 %726 }
 0x129   : > { %v731_v46 = vsel %vm393_vm0, %v730_v55, %v2541_v12  ;;  %v728_v47 = vsel %vm393_vm0, %v727_v56, %v2545_v13 }
 0x12a   : > { %586 = vrot.lane.b32.xlu1 %v575_v57, %s2168_s21 }
 0x12c   : > { %v736_v58 = vpop.permute.xlu1 %735  ;;  %v733_v59 = vpop.permute.xlu0 %732 }
 0x12d   : > { %v737_v48 = vsel %vm393_vm0, %v736_v58, %v2553_v14  ;;  %v734_v49 = vsel %vm393_vm0, %v733_v59, %v2557_v15 }
 0x130   : > { %v898_v60 = vpop.permute.xlu1 %897  ;;  %v895_v61 = vpop.permute.xlu0 %894 }
 0x131   : > { %v899_v50 = vsel %vm393_vm0, %v898_v60, %v2565_v16  ;;  %v896_v51 = vsel %vm393_vm0, %v895_v61, %v2569_v17 }
 0x134   : > { %v904_v62 = vpop.permute.xlu1 %903  ;;  %v901_v63 = vpop.permute.xlu0 %900 }
 0x135   : > { %v905_v52 = vsel %vm393_vm0, %v904_v62, %v2577_v18  ;;  %v902_v53 = vsel %vm393_vm0, %v901_v63, %v2581_v19 }
 0x138   : > { %v742_v32 = vpop.permute.xlu1 %741  ;;  %v739_v33 = vpop.permute.xlu0 %738 }
 0x139   : > { %v743_v54 = vsel %vm393_vm0, %v742_v32, %v2589_v20  ;;  %v740_v55 = vsel %vm393_vm0, %v739_v33, %v2593_v21 }
 0x13c   : > { %v910_v34 = vpop.permute.xlu1 %909  ;;  %v907_v35 = vpop.permute.xlu0 %906 }
 0x13d   : > { %v911_v56 = vsel %vm393_vm0, %v910_v34, %v2601_v22  ;;  %v908_v57 = vsel %vm393_vm0, %v907_v35, %v2605_v23 }
 0x140   : > { %v1066_v36 = vpop.permute.xlu1 %1065  ;;  %v1063_v37 = vpop.permute.xlu0 %1062 }
 0x141   : > { %v1067_v58 = vsel %vm393_vm0, %v1066_v36, %v2613_v24  ;;  %v1064_v59 = vsel %vm393_vm0, %v1063_v37, %v2617_v25 }
 0x144   : > { %v1072_v38 = vpop.permute.xlu1 %1071  ;;  %v1069_v39 = vpop.permute.xlu0 %1068 }
 0x145   : > { %v1073_v60 = vsel %vm393_vm0, %v1072_v38, %v2625_v26  ;;  %v1070_v61 = vsel %vm393_vm0, %v1069_v39, %v2629_v27 }
 0x148   : > { %v1078_v40 = vpop.permute.xlu1 %1077  ;;  %v1075_v41 = vpop.permute.xlu0 %1074 }
 0x149   : > { %v1079_v62 = vsel %vm393_vm0, %v1078_v40, %v2637_v28  ;;  %v1076_v63 = vsel %vm393_vm0, %v1075_v41, %v2641_v29 }
 0x14c   : > { %v1490_v42 = vpop.permute.xlu1 %1489  ;;  %v1487_v43 = vpop.permute.xlu0 %1486 }
 0x14d   : > { %v1491_v44 = vsel %vm393_vm0, %v1490_v42, %v2648_v30  ;;  %v1488_v45 = vsel %vm393_vm0, %v1487_v43, %v2651_v31 }
 0x14e   : > { %1494 = vrot.lane.b32.xlu1 %v1491_v44, %s2168_s21  ;;  %1492 = vrot.lane.b32.xlu0 %v1488_v45, %s2168_s21 }
 0x152   : > { %746 = vrot.lane.b32.xlu1 %v731_v46, %s2168_s21  ;;  %744 = vrot.lane.b32.xlu0 %v728_v47, %s2168_s21 }
 0x156   : > { %750 = vrot.lane.b32.xlu1 %v737_v48, %s2168_s21  ;;  %748 = vrot.lane.b32.xlu0 %v734_v49, %s2168_s21 }
 0x15a   : > { %914 = vrot.lane.b32.xlu1 %v899_v50, %s2168_s21  ;;  %912 = vrot.lane.b32.xlu0 %v896_v51, %s2168_s21 }
 0x15e   : > { %918 = vrot.lane.b32.xlu1 %v905_v52, %s2168_s21  ;;  %916 = vrot.lane.b32.xlu0 %v902_v53, %s2168_s21 }
 0x162   : > { %754 = vrot.lane.b32.xlu1 %v743_v54, %s2168_s21  ;;  %752 = vrot.lane.b32.xlu0 %v740_v55, %s2168_s21 }
 0x166   : > { %922 = vrot.lane.b32.xlu1 %v911_v56, %s2168_s21  ;;  %920 = vrot.lane.b32.xlu0 %v908_v57, %s2168_s21 }
 0x16a   : > { %1082 = vrot.lane.b32.xlu1 %v1067_v58, %s2168_s21  ;;  %1080 = vrot.lane.b32.xlu0 %v1064_v59, %s2168_s21 }
 0x16e   : > { %1086 = vrot.lane.b32.xlu1 %v1073_v60, %s2168_s21  ;;  %1084 = vrot.lane.b32.xlu0 %v1070_v61, %s2168_s21 }
 0x172   : > { %1090 = vrot.lane.b32.xlu1 %v1079_v62, %s2168_s21  ;;  %1088 = vrot.lane.b32.xlu0 %v1076_v63, %s2168_s21 }
 0x176   : > { %438 = vrot.lane.b32.xlu1 %v2493_v3, %s2169_s27  ;;  %436 = vrot.lane.b32.xlu0 %v2483_v1, %s2169_s27 }
 0x17a   : > { %442 = vrot.lane.b32.xlu1 %v2490_v2, %s2169_s27  ;;  %440 = vrot.lane.b32.xlu0 %v2480_v0, %s2169_s27 }
 0x17e   : > { %602 = vrot.lane.b32.xlu1 %v2500_v4, %s2169_s27  ;;  %600 = vrot.lane.b32.xlu0 %v2503_v5, %s2169_s27 }
 0x182   : > { %606 = vrot.lane.b32.xlu1 %v2510_v6, %s2169_s27  ;;  %604 = vrot.lane.b32.xlu0 %v2513_v7, %s2169_s27 }
 0x184   : > { %v413_v33 = vpop.permute.xlu0 %412 }
 0x185   : > { %v2819_v41 = vsel %vm393_vm0, %v413_v33, %v2483_v1 }
 0x186   : > { %446 = vrot.lane.b32.xlu1 %v2520_v8, %s2169_s27  ;;  %444 = vrot.lane.b32.xlu0 %v2523_v9, %s2169_s27 }
 0x188   : > { %v415_v32 = vpop.permute.xlu1 %414  ;;  %v417_v35 = vpop.permute.xlu0 %416 }
 0x189   : > { %v2815_v40 = vsel %vm393_vm0, %v415_v32, %v2493_v3  ;;  %v2831_v43 = vsel %vm393_vm0, %v417_v35, %v2480_v0 }
 0x18a   : > { %610 = vrot.lane.b32.xlu1 %v2530_v10, %s2169_s27  ;;  %608 = vrot.lane.b32.xlu0 %v2533_v11, %s2169_s27 }
 0x18c   : > { %v419_v34 = vpop.permute.xlu1 %418  ;;  %v577_v37 = vpop.permute.xlu0 %576 }
 0x18d   : > { %v2827_v42 = vsel %vm393_vm0, %v419_v34, %v2490_v2  ;;  %v2843_v47 = vsel %vm393_vm0, %v577_v37, %v2503_v5 }
 0x18e   : > { %770 = vrot.lane.b32.xlu1 %v2541_v12, %s2169_s27  ;;  %768 = vrot.lane.b32.xlu0 %v2545_v13, %s2169_s27 }
 0x190   : > { %v579_v36 = vpop.permute.xlu1 %578  ;;  %v581_v39 = vpop.permute.xlu0 %580 }
 0x191   : > { %v2839_v46 = vsel %vm393_vm0, %v579_v36, %v2500_v4  ;;  %v2855_v51 = vsel %vm393_vm0, %v581_v39, %v2513_v7 }
 0x192   : > { %774 = vrot.lane.b32.xlu1 %v2553_v14, %s2169_s27  ;;  %772 = vrot.lane.b32.xlu0 %v2557_v15, %s2169_s27 }
 0x194   : > { %v583_v38 = vpop.permute.xlu1 %582  ;;  %v421_v45 = vpop.permute.xlu0 %420 }
 0x195   : > { %v2851_v50 = vsel %vm393_vm0, %v583_v38, %v2510_v6  ;;  %v2871_v55 = vsel %vm393_vm0, %v421_v45, %v2523_v9 }
 0x196   : > { %938 = vrot.lane.b32.xlu1 %v2565_v16, %s2169_s27  ;;  %936 = vrot.lane.b32.xlu0 %v2569_v17, %s2169_s27 }
 0x198   : > { %v423_v44 = vpop.permute.xlu1 %422  ;;  %v585_v49 = vpop.permute.xlu0 %584 }
 0x199   : > { %v2867_v54 = vsel %vm393_vm0, %v423_v44, %v2520_v8  ;;  %v2883_v59 = vsel %vm393_vm0, %v585_v49, %v2533_v11 }
 0x19a   : > { %942 = vrot.lane.b32.xlu1 %v2577_v18, %s2169_s27  ;;  %940 = vrot.lane.b32.xlu0 %v2581_v19, %s2169_s27 }
 0x19c   : > { %v587_v48 = vpop.permute.xlu1 %586 }
 0x19d   : > { %v2879_v58 = vsel %vm393_vm0, %v587_v48, %v2530_v10 }
 0x19e   : > { %778 = vrot.lane.b32.xlu1 %v2589_v20, %s2169_s27  ;;  %776 = vrot.lane.b32.xlu0 %v2593_v21, %s2169_s27 }
 0x1a2   : > { %946 = vrot.lane.b32.xlu1 %v2601_v22, %s2169_s27  ;;  %944 = vrot.lane.b32.xlu0 %v2605_v23, %s2169_s27 }
 0x1a6   : > { %1106 = vrot.lane.b32.xlu1 %v2613_v24, %s2169_s27  ;;  %1104 = vrot.lane.b32.xlu0 %v2617_v25, %s2169_s27 }
 0x1aa   : > { %1110 = vrot.lane.b32.xlu1 %v2625_v26, %s2169_s27  ;;  %1108 = vrot.lane.b32.xlu0 %v2629_v27, %s2169_s27 }
 0x1ae   : > { %1114 = vrot.lane.b32.xlu1 %v2637_v28, %s2169_s27  ;;  %1112 = vrot.lane.b32.xlu0 %v2641_v29, %s2169_s27 }
 0x1b2   : > { %468 = vrot.lane.b32.xlu1 %v2815_v40, %s2170_s7  ;;  %466 = vrot.lane.b32.xlu0 %v2819_v41, %s2170_s7 }
 0x1b6   : > { %472 = vrot.lane.b32.xlu1 %v2827_v42, %s2170_s7  ;;  %470 = vrot.lane.b32.xlu0 %v2831_v43, %s2170_s7 }
 0x1ba   : > { %632 = vrot.lane.b32.xlu1 %v2839_v46, %s2170_s7  ;;  %630 = vrot.lane.b32.xlu0 %v2843_v47, %s2170_s7 }
 0x1be   : > { %636 = vrot.lane.b32.xlu1 %v2851_v50, %s2170_s7  ;;  %634 = vrot.lane.b32.xlu0 %v2855_v51, %s2170_s7 }
 0x1c0   : > { %v2861_v52 = vpop.permute.xlu1 %1494  ;;  %v2863_v53 = vpop.permute.xlu0 %1492 }
 0x1c2   : > { %476 = vrot.lane.b32.xlu1 %v2867_v54, %s2170_s7  ;;  %474 = vrot.lane.b32.xlu0 %v2871_v55, %s2170_s7 }
 0x1c4   : > { %v747_v56 = vpop.permute.xlu1 %746  ;;  %v745_v57 = vpop.permute.xlu0 %744 }
 0x1c5   : > { %v2891_v62 = vsel %vm393_vm0, %v747_v56, %v2541_v12  ;;  %v2895_v63 = vsel %vm393_vm0, %v745_v57, %v2545_v13 }
 0x1c6   : > { %640 = vrot.lane.b32.xlu1 %v2879_v58, %s2170_s7  ;;  %638 = vrot.lane.b32.xlu0 %v2883_v59, %s2170_s7 }
 0x1c8   : > { %v751_v60 = vpop.permute.xlu1 %750  ;;  %v749_v61 = vpop.permute.xlu0 %748 }
 0x1c9   : > { %v2903_v34 = vsel %vm393_vm0, %v751_v60, %v2553_v14  ;;  %v2907_v12 = vsel %vm393_vm0, %v749_v61, %v2557_v15 }
 0x1ca   : > { %800 = vrot.lane.b32.xlu1 %v2891_v62, %s2170_s7  ;;  %798 = vrot.lane.b32.xlu0 %v2895_v63, %s2170_s7 }
 0x1cc   : > { %v915_v32 = vpop.permute.xlu1 %914  ;;  %v913_v33 = vpop.permute.xlu0 %912 }
 0x1cd   : > { %v2915_v36 = vsel %vm393_vm0, %v915_v32, %v2565_v16  ;;  %v2919_v14 = vsel %vm393_vm0, %v913_v33, %v2569_v17 }
 0x1ce   : > { %804 = vrot.lane.b32.xlu1 %v2903_v34, %s2170_s7  ;;  %802 = vrot.lane.b32.xlu0 %v2907_v12, %s2170_s7 }
 0x1d0   : > { %v919_v13 = vpop.permute.xlu1 %918  ;;  %v917_v35 = vpop.permute.xlu0 %916 }
 0x1d1   : > { %v2927_v38 = vsel %vm393_vm0, %v919_v13, %v2577_v18  ;;  %v2931_v16 = vsel %vm393_vm0, %v917_v35, %v2581_v19  ;;  %v2171_v13 = vmov 0   ;;  %v3004_v35 = vsel %vm393_vm0, %v2861_v52, %v2648_v30 }
 0x1d2   : > { %968 = vrot.lane.b32.xlu1 %v2915_v36, %s2170_s7  ;;  %966 = vrot.lane.b32.xlu0 %v2919_v14, %s2170_s7  ;;  %3720 = vst [vmem:[#allocation35_spill] sm:$0xff] %v3004_v35 }
 0x1d3   : > { %1920 = vset.pattern.permute.xlu1 %v2171_v13  ;;  %1919 = vset.pattern.permute.xlu0 %v2171_v13 }
 0x1d4   : > { %v755_v15 = vpop.permute.xlu1 %754  ;;  %v753_v37 = vpop.permute.xlu0 %752 }
 0x1d5   : > { %v2939_v44 = vsel %vm393_vm0, %v755_v15, %v2589_v20  ;;  %v2943_v18 = vsel %vm393_vm0, %v753_v37, %v2593_v21  ;;  %v3009_v15 = vsel %vm393_vm0, %v2863_v53, %v2651_v31 }
 0x1d6   : > { %972 = vrot.lane.b32.xlu1 %v2927_v38, %s2170_s7  ;;  %970 = vrot.lane.b32.xlu0 %v2931_v16, %s2170_s7  ;;  %3721 = vst [vmem:[#allocation36_spill] sm:$0xff] %v3009_v15 }
 0x1d8   : > { %v923_v17 = vpop.permute.xlu1 %922  ;;  %v921_v39 = vpop.permute.xlu0 %920 }
 0x1d9   : > { %v2951_v48 = vsel %vm393_vm0, %v923_v17, %v2601_v22  ;;  %v2955_v20 = vsel %vm393_vm0, %v921_v39, %v2605_v23 }
 0x1da   : > { %808 = vrot.lane.b32.xlu1 %v2939_v44, %s2170_s7  ;;  %806 = vrot.lane.b32.xlu0 %v2943_v18, %s2170_s7 }
 0x1dc   : > { %v1083_v19 = vpop.permute.xlu1 %1082  ;;  %v1081_v45 = vpop.permute.xlu0 %1080 }
 0x1dd   : > { %v2963_v56 = vsel %vm393_vm0, %v1083_v19, %v2613_v24  ;;  %v2967_v22 = vsel %vm393_vm0, %v1081_v45, %v2617_v25 }
 0x1de   : > { %976 = vrot.lane.b32.xlu1 %v2951_v48, %s2170_s7  ;;  %974 = vrot.lane.b32.xlu0 %v2955_v20, %s2170_s7 }
 0x1e0   : > { %v1087_v21 = vpop.permute.xlu1 %1086  ;;  %v1085_v49 = vpop.permute.xlu0 %1084 }
 0x1e1   : > { %v2975_v60 = vsel %vm393_vm0, %v1087_v21, %v2625_v26  ;;  %v2979_v24 = vsel %vm393_vm0, %v1085_v49, %v2629_v27 }
 0x1e2   : > { %1136 = vrot.lane.b32.xlu1 %v2963_v56, %s2170_s7  ;;  %1134 = vrot.lane.b32.xlu0 %v2967_v22, %s2170_s7  ;;  %3716 = vst [vmem:[#allocation31_spill] sm:$0xff] %v2975_v60  ;;  %3717 = vst [vmem:[#allocation32_spill] sm:$0xff] %v2979_v24 }
 0x1e4   : > { %v1091_v23 = vpop.permute.xlu1 %1090  ;;  %v1089_v57 = vpop.permute.xlu0 %1088 }
 0x1e5   : > { %v2987_v32 = vsel %vm393_vm0, %v1091_v23, %v2637_v28  ;;  %v2991_v26 = vsel %vm393_vm0, %v1089_v57, %v2641_v29 }
 0x1e6   : > { %1140 = vrot.lane.b32.xlu1 %v2975_v60, %s2170_s7  ;;  %1138 = vrot.lane.b32.xlu0 %v2979_v24, %s2170_s7  ;;  %3718 = vst [vmem:[#allocation33_spill] sm:$0xff] %v2987_v32  ;;  %3719 = vst [vmem:[#allocation34_spill] sm:$0xff] %v2991_v26 }
 0x1e8   : > { %v439_v25 = vpop.permute.xlu1 %438  ;;  %v437_v61 = vpop.permute.xlu0 %436 }
 0x1ea   : > { %1144 = vrot.lane.b32.xlu1 %v2987_v32, %s2170_s7  ;;  %1142 = vrot.lane.b32.xlu0 %v2991_v26, %s2170_s7 }
 0x1ec   : > { %v443_v27 = vpop.permute.xlu1 %442  ;;  %v441_v33 = vpop.permute.xlu0 %440 }
 0x1ed   : > { %v457_v24 = vadd.f32 %v443_v27, %v2827_v42  ;;  %v456_v60 = vadd.f32 %v441_v33, %v2831_v43 }
 0x1ee   : > { %1513 = vrot.lane.b32.xlu1 %v2648_v30, %s2172_s29  ;;  %1511 = vrot.lane.b32.xlu0 %v2651_v31, %s2172_s29 }
 0x1f0   : > { %v603_v28 = vpop.permute.xlu1 %602  ;;  %v601_v29 = vpop.permute.xlu0 %600 }
 0x1f2   : > { %1502 = vrot.lane.b32.xlu1 %v3004_v35, %s2170_s7  ;;  %1500 = vrot.lane.b32.xlu0 %v3009_v15, %s2170_s7  ;;  %v455_v35 = vadd.f32 %v439_v25, %v2815_v40  ;;  %v454_v15 = vadd.f32 %v437_v61, %v2819_v41  ;;  %v619_v25 = vadd.f32 %v603_v28, %v2839_v46 }
 0x1f3   : > { %v618_v61 = vadd.f32 %v601_v29, %v2843_v47 }
 0x1f4   : > { %v607_v37 = vpop.permute.xlu1 %606  ;;  %v605_v17 = vpop.permute.xlu0 %604 }
 0x1f8   : > { %v447_v39 = vpop.permute.xlu1 %446  ;;  %v445_v19 = vpop.permute.xlu0 %444 }
 0x1fc   : > { %v611_v45 = vpop.permute.xlu1 %610  ;;  %v609_v21 = vpop.permute.xlu0 %608 }
 0x1fd   : > { %v623_v28 = vadd.f32 %v611_v45, %v2879_v58  ;;  %v622_v29 = vadd.f32 %v609_v21, %v2883_v59 }
 0x200   : > { %v3015_v49 = vpop.permute.xlu1 %770  ;;  %v3017_v52 = vpop.permute.xlu0 %768 }
 0x204   : > { %v3019_v23 = vpop.permute.xlu1 %774  ;;  %v3021_v53 = vpop.permute.xlu0 %772 }
 0x208   : > { %v3023_v57 = vpop.permute.xlu1 %938  ;;  %v3025_v13 = vpop.permute.xlu0 %936 }
 0x20c   : > { %v3027_v10 = vpop.permute.xlu1 %942  ;;  %v3029_v11 = vpop.permute.xlu0 %940 }
 0x210   : > { %v3031_v6 = vpop.permute.xlu1 %778  ;;  %v3033_v4 = vpop.permute.xlu0 %776 }
 0x214   : > { %v3035_v7 = vpop.permute.xlu1 %946  ;;  %v3037_v5 = vpop.permute.xlu0 %944 }
 0x218   : > { %v3039_v8 = vpop.permute.xlu1 %1106  ;;  %v3041_v9 = vpop.permute.xlu0 %1104 }
 0x21c   : > { %v3043_v2 = vpop.permute.xlu1 %1110  ;;  %v3045_v3 = vpop.permute.xlu0 %1108 }
 0x21d   : > { %3722 = vst [vmem:[#allocation37_spill] sm:$0xff] %v3043_v2  ;;  %3723 = vst [vmem:[#allocation38_spill] sm:$0xff] %v3045_v3 }
 0x220   : > { %v3047_v0 = vpop.permute.xlu1 %1114  ;;  %v3049_v1 = vpop.permute.xlu0 %1112 }
 0x221   : > { %3724 = vst [vmem:[#allocation39_spill] sm:$0xff] %v3047_v0  ;;  %3725 = vst [vmem:[#allocation40_spill] sm:$0xff] %v3049_v1 }
 0x224   : > { %v469_v31 = vpop.permute.xlu1 %468  ;;  %v467_v30 = vpop.permute.xlu0 %466 }
 0x225   : > { %v485_v26 = vadd.f32 %v469_v31, %v455_v35  ;;  %v484_v32 = vadd.f32 %v467_v30, %v454_v15 }
 0x227   : > { %498 = vrot.lane.b32.xlu1 %v485_v26, %s2173_s0  ;;  %496 = vrot.lane.b32.xlu0 %v484_v32, %s2173_s0  ;;  %v621_v26 = vadd.f32 %v607_v37, %v2851_v50  ;;  %v620_v32 = vadd.f32 %v605_v17, %v2855_v51 }
 0x228   : > { %v473_v0 = vpop.permute.xlu1 %472  ;;  %v471_v3 = vpop.permute.xlu0 %470 }
 0x229   : > { %v487_v1 = vadd.f32 %v473_v0, %v457_v24  ;;  %v486_v2 = vadd.f32 %v471_v3, %v456_v60 }
 0x22b   : > { %502 = vrot.lane.b32.xlu1 %v487_v1, %s2173_s0  ;;  %500 = vrot.lane.b32.xlu0 %v486_v2, %s2173_s0  ;;  %v459_v1 = vadd.f32 %v447_v39, %v2867_v54  ;;  %v458_v2 = vadd.f32 %v445_v19, %v2871_v55  ;;  %v787_v39 = vadd.f32 %v3015_v49, %v2891_v62 }
 0x22c   : > { %v633_v30 = vpop.permute.xlu1 %632  ;;  %v631_v31 = vpop.permute.xlu0 %630  ;;  %v786_v19 = vadd.f32 %v3017_v52, %v2895_v63 }
 0x22d   : > { %v649_v27 = vadd.f32 %v633_v30, %v619_v25  ;;  %v648_v33 = vadd.f32 %v631_v31, %v618_v61  ;;  %v789_v25 = vadd.f32 %v3019_v23, %v2903_v34  ;;  %v788_v61 = vadd.f32 %v3021_v53, %v2907_v12 }
 0x22e   : > { %v955_v30 = vadd.f32 %v3023_v57, %v2915_v36  ;;  %v954_v31 = vadd.f32 %v3025_v13, %v2919_v14 }
 0x22f   : > { %662 = vrot.lane.b32.xlu1 %v649_v27, %s2173_s0  ;;  %660 = vrot.lane.b32.xlu0 %v648_v33, %s2173_s0  ;;  %v957_v27 = vadd.f32 %v3027_v10, %v2927_v38  ;;  %v956_v33 = vadd.f32 %v3029_v11, %v2931_v16 }
 0x230   : > { %v637_v0 = vpop.permute.xlu1 %636  ;;  %v635_v3 = vpop.permute.xlu0 %634 }
 0x231   : > { %v651_v46 = vadd.f32 %v637_v0, %v621_v26  ;;  %v650_v47 = vadd.f32 %v635_v3, %v620_v32  ;;  %v791_v26 = vadd.f32 %v3031_v6, %v2939_v44  ;;  %v790_v32 = vadd.f32 %v3033_v4, %v2943_v18 }
 0x232   : > { %v959_v0 = vadd.f32 %v3035_v7, %v2951_v48  ;;  %v958_v3 = vadd.f32 %v3037_v5, %v2955_v20 }
 0x233   : > { %666 = vrot.lane.b32.xlu1 %v651_v46, %s2173_s0  ;;  %664 = vrot.lane.b32.xlu0 %v650_v47, %s2173_s0  ;;  %v1123_v46 = vadd.f32 %v3039_v8, %v2963_v56  ;;  %v1122_v47 = vadd.f32 %v3041_v9, %v2967_v22 }
 0x234   : > { %v477_v60 = vpop.permute.xlu1 %476  ;;  %v475_v50 = vpop.permute.xlu0 %474 }
 0x235   : > { %v489_v24 = vadd.f32 %v477_v60, %v459_v1  ;;  %v488_v51 = vadd.f32 %v475_v50, %v458_v2  ;;  %v3726_v1 = vld [vmem:[#allocation31_spill] sm:$0xff]  ;;  %v3727_v2 = vld [vmem:[#allocation37_spill] sm:$0xff]  ;;  %v3728_v50 = vld [vmem:[#allocation32_spill] sm:$0xff] }
 0x236   : > { %v1125_v60 = vadd.f32 %v3727_v2, %v3726_v1  ;;  %v3747_v1 = vld [vmem:[#allocation23_spill] sm:$0xff] }
 0x237   : > { %506 = vrot.lane.b32.xlu1 %v489_v24, %s2173_s0  ;;  %504 = vrot.lane.b32.xlu0 %v488_v51, %s2173_s0  ;;  %v3729_v24 = vld [vmem:[#allocation38_spill] sm:$0xff] }
 0x238   : > { %v641_v35 = vpop.permute.xlu1 %640  ;;  %v639_v15 = vpop.permute.xlu0 %638  ;;  %v1124_v51 = vadd.f32 %v3729_v24, %v3728_v50 }
 0x239   : > { %v653_v37 = vadd.f32 %v641_v35, %v623_v28  ;;  %v652_v17 = vadd.f32 %v639_v15, %v622_v29  ;;  %v3730_v28 = vld [vmem:[#allocation33_spill] sm:$0xff]  ;;  %v3731_v29 = vld [vmem:[#allocation39_spill] sm:$0xff]  ;;  %v3732_v15 = vld [vmem:[#allocation34_spill] sm:$0xff] }
 0x23a   : > { %v1127_v35 = vadd.f32 %v3731_v29, %v3730_v28 }
 0x23b   : > { %670 = vrot.lane.b32.xlu1 %v653_v37, %s2173_s0  ;;  %668 = vrot.lane.b32.xlu0 %v652_v17, %s2173_s0  ;;  %v3733_v37 = vld [vmem:[#allocation40_spill] sm:$0xff] }
 0x23c   : > { %v801_v58 = vpop.permute.xlu1 %800  ;;  %v799_v59 = vpop.permute.xlu0 %798  ;;  %v1126_v17 = vadd.f32 %v3733_v37, %v3732_v15  ;;  %v3749_v37 = vld [vmem:[#allocation27_spill] sm:$0xff] }
 0x23d   : > { %v817_v45 = vadd.f32 %v801_v58, %v787_v39  ;;  %v816_v21 = vadd.f32 %v799_v59, %v786_v19 }
 0x23f   : > { %830 = vrot.lane.b32.xlu1 %v817_v45, %s2173_s0  ;;  %828 = vrot.lane.b32.xlu0 %v816_v21, %s2173_s0 }
 0x240   : > { %v805_v62 = vpop.permute.xlu1 %804  ;;  %v803_v63 = vpop.permute.xlu0 %802 }
 0x241   : > { %v819_v49 = vadd.f32 %v805_v62, %v789_v25  ;;  %v818_v52 = vadd.f32 %v803_v63, %v788_v61  ;;  %v3734_v25 = vld [vmem:[#allocation29_spill] sm:$0xff]  ;;  %v3735_v62 = vld [vmem:[#allocation30_spill] sm:$0xff] }
 0x242   : > { %v1557_v28 = vrot.slane %v3735_v62, 1  ;;  %v1558_v29 = vrot.slane %v3734_v25, 1 }
 0x243   : > { %834 = vrot.lane.b32.xlu1 %v819_v49, %s2173_s0  ;;  %832 = vrot.lane.b32.xlu0 %v818_v52, %s2173_s0  ;;  %v3737_v52 = vld [vmem:[#allocation35_spill] sm:$0xff] }
 0x244   : > { %v969_v34 = vpop.permute.xlu1 %968  ;;  %v967_v12 = vpop.permute.xlu0 %966 }
 0x245   : > { %v985_v23 = vadd.f32 %v969_v34, %v955_v30  ;;  %v984_v53 = vadd.f32 %v967_v12, %v954_v31  ;;  %v3739_v12 = vld [vmem:[#allocation17_spill] sm:$0xff] }
 0x247   : > { %998 = vrot.lane.b32.xlu1 %v985_v23, %s2173_s0  ;;  %996 = vrot.lane.b32.xlu0 %v984_v53, %s2173_s0  ;;  %v1390_v23 = vrot.slane %v3739_v12, 1  ;;  %v3740_v53 = vld [vmem:[#allocation20_spill] sm:$0xff] }
 0x248   : > { %v973_v36 = vpop.permute.xlu1 %972  ;;  %v971_v14 = vpop.permute.xlu0 %970 }
 0x249   : > { %v987_v57 = vadd.f32 %v973_v36, %v957_v27  ;;  %v986_v13 = vadd.f32 %v971_v14, %v956_v33  ;;  %v1392_v27 = vrot.slane %v3740_v53, 1  ;;  %v3741_v33 = vld [vmem:[#allocation19_spill] sm:$0xff]  ;;  %v3742_v14 = vld [vmem:[#allocation26_spill] sm:$0xff] }
 0x24a   : > { %v1393_v36 = vrot.slane %v3741_v33, 1  ;;  %v373_v2 = vsub.f32 %v3747_v1, %v3741_v33  ;;  %v1576_v1 = vadd.f32 %v1558_v29, %v3734_v25 }
 0x24b   : > { %1002 = vrot.lane.b32.xlu1 %v987_v57, %s2173_s0  ;;  %1000 = vrot.lane.b32.xlu0 %v986_v13, %s2173_s0  ;;  %v1391_v57 = vrot.slane %v3742_v14, 1  ;;  %v3743_v13 = vld [vmem:[#allocation25_spill] sm:$0xff] }
 0x24c   : > { %v809_v10 = vpop.permute.xlu1 %808  ;;  %v807_v11 = vpop.permute.xlu0 %806 }
 0x24d   : > { %v821_v38 = vadd.f32 %v809_v10, %v791_v26  ;;  %v820_v16 = vadd.f32 %v807_v11, %v790_v32  ;;  %v1394_v26 = vrot.slane %v3743_v13, 1 }
 0x24f   : > { %838 = vrot.lane.b32.xlu1 %v821_v38, %s2173_s0  ;;  %836 = vrot.lane.b32.xlu0 %v820_v16, %s2173_s0 }
 0x250   : > { %v977_v6 = vpop.permute.xlu1 %976  ;;  %v975_v4 = vpop.permute.xlu0 %974 }
 0x251   : > { %v989_v44 = vadd.f32 %v977_v6, %v959_v0  ;;  %v988_v18 = vadd.f32 %v975_v4, %v958_v3 }
 0x253   : > { %1006 = vrot.lane.b32.xlu1 %v989_v44, %s2173_s0  ;;  %1004 = vrot.lane.b32.xlu0 %v988_v18, %s2173_s0 }
 0x254   : > { %v1137_v7 = vpop.permute.xlu1 %1136  ;;  %v1135_v5 = vpop.permute.xlu0 %1134 }
 0x255   : > { %v1153_v48 = vadd.f32 %v1137_v7, %v1123_v46  ;;  %v1152_v20 = vadd.f32 %v1135_v5, %v1122_v47  ;;  %v3744_v46 = vld [vmem:[#allocation22_spill] sm:$0xff]  ;;  %v3745_v7 = vld [vmem:[#allocation24_spill] sm:$0xff] }
 0x256   : > { %v372_v5 = vsub.f32 %v3745_v7, %v3739_v12 }
 0x257   : > { %1166 = vrot.lane.b32.xlu1 %v1153_v48, %s2173_s0  ;;  %1164 = vrot.lane.b32.xlu0 %v1152_v20, %s2173_s0  ;;  %v3746_v48 = vld [vmem:[#allocation21_spill] sm:$0xff] }
 0x258   : > { %v1141_v8 = vpop.permute.xlu1 %1140  ;;  %v1139_v9 = vpop.permute.xlu0 %1138  ;;  %v371_v20 = vsub.f32 %v3746_v48, %v3740_v53 }
 0x259   : > { %v1155_v56 = vadd.f32 %v1141_v8, %v1125_v60  ;;  %v1154_v22 = vadd.f32 %v1139_v9, %v1124_v51 }
 0x25b   : > { %1170 = vrot.lane.b32.xlu1 %v1155_v56, %s2173_s0  ;;  %1168 = vrot.lane.b32.xlu0 %v1154_v22, %s2173_s0  ;;  %v1553_v56 = vrot.slane %v3735_v62, 7  ;;  %v1554_v22 = vrot.slane %v3734_v25, 7 }
 0x25c   : > { %v1145_v39 = vpop.permute.xlu1 %1144  ;;  %v1143_v19 = vpop.permute.xlu0 %1142 }
 0x25d   : > { %v1157_v58 = vadd.f32 %v1145_v39, %v1127_v35  ;;  %v1156_v59 = vadd.f32 %v1143_v19, %v1126_v17  ;;  %v3748_v35 = vld [vmem:[#allocation28_spill] sm:$0xff]  ;;  %v375_v17 = vsub.f32 %v3749_v37, %v3743_v13  ;;  %v378_v19 = vand.u32 2147483647, %v372_v5 }
 0x25e   : > { %v374_v15 = vsub.f32 %v3748_v35, %v3742_v14 }
 0x25f   : > { %1174 = vrot.lane.b32.xlu1 %v1157_v58, %s2173_s0  ;;  %1172 = vrot.lane.b32.xlu0 %v1156_v59, %s2173_s0  ;;  %v377_v58 = vand.u32 2147483647, %v371_v20  ;;  %v379_v59 = vand.u32 2147483647, %v373_v2 }
 0x260   : > { %v1514_v45 = vpop.permute.xlu1 %1513  ;;  %v1512_v21 = vpop.permute.xlu0 %1511 }
 0x261   : > { %v1518_v61 = vadd.f32 %v1514_v45, %v3734_v25  ;;  %v1517_v63 = vadd.f32 %v1512_v21, %v3735_v62 }
 0x263   : > { %1403 = vrot.lane.b32.xlu1 %v2815_v40, %s2172_s29  ;;  %1401 = vrot.lane.b32.xlu0 %v2819_v41, %s2172_s29  ;;  %v2174_v41 = vmov 14  }
 0x264   : > { %v1501_v40 = vpop.permute.xlu0 %1500  ;;  %v1503_v49 = vpop.permute.xlu1 %1502 }
 0x265   : > { %v1507_v30 = vadd.f32 %v1503_v49, %v3737_v52  ;;  %v380_v52 = vand.u32 2147483647, %v374_v15 }
 0x267   : > { %1407 = vrot.lane.b32.xlu1 %v2827_v42, %s2172_s29  ;;  %1405 = vrot.lane.b32.xlu0 %v2831_v43, %s2172_s29  ;;  %v3736_v42 = vld [vmem:[#allocation36_spill] sm:$0xff] }
 0x268   : > { %v1506_v43 = vadd.f32 %v1501_v40, %v3736_v42 }
 0x26b   : > { %1411 = vrot.lane.b32.xlu1 %v2867_v54, %s2172_s29  ;;  %1409 = vrot.lane.b32.xlu0 %v2871_v55, %s2172_s29  ;;  %v365_v54 = vlaneseq  ;;  %v3738_v55 = vld [vmem:[#allocation18_spill] sm:$0xff] }
 0x26c   : > { %v1389_v34 = vrot.slane %v3738_v55, 1  ;;  %v370_v47 = vsub.f32 %v3744_v46, %v3738_v55 }
 0x26d   : > { %v3147_v31 = vshrl.u32 %v365_v54, 7 }
 0x26e   : > { %v376_v39 = vand.u32 2147483647, %v370_v47 }
 0x26f   : > { %1526 = vperm.xlu1 %1920, %v1518_v61   ;;  %1521 = vperm.xlu0 %1919, %v1517_v63   ;;  %vm539_vm1 = vcmp.lt.s32.totalorder %v3147_v31, 7  ;;  %vm520_vm3 = vcmp.lt.s32.totalorder %v3147_v31, 1  ;;  %v1570_v49 = vsub.s32 0, %v3147_v31  ;;  %vm1369_vm5 = vcmp.ge.s32.totalorder %v3147_v31, 1 }
 0x270   : > { %v1395_v32 = vsel %vm539_vm1, %v1389_v34, %v1392_v27  ;;  %v1396_v10 = vsel %vm539_vm1, %v1390_v23, %v1393_v36  ;;  %v1397_v11 = vsel %vm539_vm1, %v1391_v57, %v1394_v26  ;;  %v1398_v38 = vsel %vm539_vm1, %v1392_v27, %v1389_v34 }
 0x271   : > { %v1399_v16 = vsel %vm539_vm1, %v1393_v36, %v1390_v23  ;;  %v1449_v0 = vsub.f32 %v3738_v55, %v1395_v32  ;;  %v1451_v3 = vsub.f32 %v3739_v12, %v1396_v10  ;;  %v1450_v6 = vsub.f32 %v3740_v53, %v1398_v38  ;;  %v3223_v38 = vld [vmem:[%s2470_s14 + $0x8] sm:$0xff] }
 0x272   : > { %v1452_v4 = vsub.f32 %v3741_v33, %v1399_v16  ;;  %v1453_v44 = vsub.f32 %v3742_v14, %v1397_v11  ;;  %v1400_v18 = vsel %vm539_vm1, %v1394_v26, %v1391_v57  ;;  %v1559_v42 = vsel %vm539_vm1, %v1557_v28, %v1558_v29  ;;  %v3220_v11 = vld [vmem:[%s2470_s14] sm:$0xff]  ;;  %3754 = vst [vmem:[#allocation33_spill] sm:$0xff] %v3223_v38  ;;  %s2074_s14 = sshll.u32 %s2176_s18, 4  ;;  %s2075_s14 = int_to_ptr.vmem [resolvable:$false] %s2074_s14 }
 0x273   : > { %1921 = vset.pattern.permute.xlu1 %v2174_v41  ;;  %1922 = vset.pattern.permute.xlu0 %v2174_v41  ;;  %v1455_v60 = vand.u32 2147483647, %v1449_v0  ;;  %v1457_v50 = vand.u32 2147483647, %v1451_v3  ;;  %v1454_v24 = vsub.f32 %v3743_v13, %v1400_v18  ;;  %v1456_v51 = vand.u32 2147483647, %v1450_v6  ;;  %p2077_p11 = scmp.lt.s32.totalorder %s3589_s1, %s2075_s14 }
 0x274   : > { %1540 = vperm.xlu1 %1921, %v1517_v63   ;;  %1544 = vperm.xlu0 %1922, %v1518_v61   ;;  %v1458_v8 = vand.u32 2147483647, %v1452_v4  ;;  %v1459_v9 = vand.u32 2147483647, %v1453_v44  ;;  %v1556_v41 = vsel %vm520_vm3, %v1554_v22, %v1553_v56  ;;  %v383_v55 = vsel %vm382_vm2, %v376_v39, 0.0  ;;  %3753 = vst [vmem:[#allocation38_spill] sm:$0xff] %v3220_v11 }
 0x275   : > { %v1461_v45 = vsel %vm382_vm2, %v1455_v60, 0.0  ;;  %v1460_v21 = vand.u32 2147483647, %v1454_v24  ;;  %v1462_v61 = vsel %vm382_vm2, %v1457_v50, 0.0  ;;  %v1466_v63 = vsel %vm382_vm2, %v1456_v51, 0.0  ;;  %s2076_s6 = scalar_lea.vmem %s2075_s14, 32 }
 0x276   : > { %v1467_v40 = vsel %vm382_vm2, %v1458_v8, 0.0  ;;  %v384_v34 = vsel %vm382_vm2, %v378_v19, 0.0  ;;  %v388_v12 = vsel %vm382_vm2, %v377_v58, 0.0  ;;  %v389_v23 = vsel %vm382_vm2, %v379_v59, 0.0  ;;  %p2078_p5 = scmp.lt.s32.totalorder %s2076_s6, %s2070_s9 }
 0x277   : > { %v1463_v53 = vadd.f32 %v1462_v61, %v1461_v45  ;;  %v1468_v27 = vadd.f32 %v1467_v40, %v1466_v63  ;;  %v3205_v33 = vand.u32 127, %v365_v54  ;;  %v1464_v36 = vsel %vm382_vm2, %v1459_v9, 0.0 }
 0x278   : > { %1531 = vrot.lane.b32.xlu1 %v1506_v43, %s2173_s0  ;;  %v1567_v43 = vadd.f32 %v1557_v28, %v3735_v62  ;;  %v1469_v14 = vsel %vm382_vm2, %v1460_v21, 0.0  ;;  %v3210_v57 = vmul.f32 2.0, %v3735_v62  ;;  %v3212_v13 = vadd.f32 %v1559_v42, %v1556_v41  ;;  %p2079_p4 = por %p2078_p5, %p2077_p11 }
 0x279   : > { %v3215_v26 = vadd.s32 8, %v3147_v31  ;;  %v385_v32 = vadd.f32 %v384_v34, %v383_v55  ;;  %v386_v54 = vsel %vm382_vm2, %v380_v52, 0.0  ;;  %v390_v16 = vadd.f32 %v389_v23, %v388_v12 }
 0x27a   : > { %3750 = vst [vmem:[#allocation31_spill] sm:$0xff] %v3210_v57  ;;  %3751 = vst [vmem:[#allocation37_spill] sm:$0xff] %v3212_v13  ;;  %v3217_v10 = vrot.slane %v1567_v43, %v1570_v49  ;;  %v1611_v6 = vsel %vm382_vm2, %v3220_v11, 0.0  ;;  %v1612_v4 = vsel %vm382_vm2, %v3223_v38, 0.0  ;;  %v1465_v44 = vadd.f32 %v1464_v36, %v1463_v53  ;;  %p2080_p6 = pnand %p2079_p4, %p2073_p12 }
 0x27b   : > { %v1470_v18 = vadd.f32 %v1469_v14, %v1468_v27  ;;  %v1555_v48 = vsel %vm520_vm3, %v1553_v56, %v1554_v22  ;;  %v1560_v20 = vsel %vm539_vm1, %v1558_v29, %v1557_v28  ;;  %v3236_v2 = vadd.f32 %v386_v54, %v385_v32 }
 0x27c   : > { %1533 = vrot.lane.b32.xlu1 %v1507_v30, %s2173_s0  ;;  %v381_v30 = vand.u32 2147483647, %v375_v17  ;;  %3752 = vst [vmem:[#allocation32_spill] sm:$0xff] %v3217_v10  ;;  %v1579_v24 = vsub.s32 6, %v3147_v31  ;;  %v1613_v51 = vadd.f32 %v1612_v4, %v1611_v6  ;;  %v1471_v22 = vmul.f32 0.33333334, %v1465_v44 }
 0x27d   : > { %3755 = vst [vmem:[#allocation39_spill] sm:$0xff] %v3236_v2  ;;  %v1472_v15 = vmul.f32 0.33333334, %v1470_v18  ;;  %v3253_v61 = vadd.f32 %v1560_v20, %v1555_v48  ;;  %vm1483_vm4 = vcmp.eq.s32.totalorder %v3215_v26, 15  ;;  %vm1375_vm6 = vcmp.ge.s32.totalorder %v3205_v33, 1 }
 0x27e   : > { %v391_v0 = vsel %vm382_vm2, %v381_v30, 0.0  ;;  %v3255_v42 = vrot.slane %v1576_v1, %v1579_v24  ;;  %v3257_v43 = vmul.f32 -10.0, %v1471_v22  ;;  %vm1372_vm7 = vcmp.le.s32.totalorder %v3215_v26, 14  ;;  %vm3527_vm11 = vmand %vm1369_vm5, %vm1375_vm6 }
 0x27f   : > { %v3245_v37 = vadd.f32 %v391_v0, %v390_v16  ;;  %v3259_v49 = vmul.f32 -10.0, %v1472_v15  ;;  %vm1508_vm8 = vcmp.eq.s32.totalorder %v3205_v33, 0  ;;  %vm1563_vm9 = vcmp.eq.s32.totalorder %v3147_v31, 0  ;;  %vm1377_vm12 = vmand %vm1372_vm7, %vm1375_vm6 }
 0x280   : > { %vm1378_vm10 = vcmp.le.s32.totalorder %v3205_v33, 14  ;;  %vm1479_vm13 = vcmp.eq.s32.totalorder %v3205_v33, 15  ;;  %vm1637_vm0 = vcmp.eq.s32.totalorder %v3205_v33, 1 }
 0x281   : > { %3756 = vst [vmem:[#allocation34_spill] sm:$0xff] %v3245_v37  ;;  %vm1379_vm14 = vmand %vm3527_vm11, %vm1378_vm10 }
 0x282   : > { %vm1380_vm15 = vmand %vm1377_vm12, %vm1378_vm10 }
 0x299   : > { %v499_v3 = vpop.permute.xlu1 %498  ;;  %v497_v62 = vpop.permute.xlu0 %496 }
 0x29a   : > { %v517_v46 = vrot.slane %v499_v3, 7  ;;  %v536_v47 = vrot.slane %v499_v3, 1  ;;  %v514_v7 = vrot.slane %v497_v62, 7  ;;  %v533_v5 = vrot.slane %v497_v62, 1 }
 0x29c   : > { %v521_v60 = vsel %vm520_vm3, %v514_v7, %v517_v46  ;;  %v524_v50 = vsel %vm520_vm3, %v517_v46, %v514_v7  ;;  %v540_v25 = vsel %vm539_vm1, %v533_v5, %v536_v47  ;;  %v543_v17 = vsel %vm539_vm1, %v536_v47, %v533_v5 }
 0x29d   : > { %v527_v8 = vadd.f32 %v524_v50, %v497_v62  ;;  %v528_v9 = vadd.f32 %v521_v60, %v499_v3  ;;  %v503_v35 = vpop.permute.xlu1 %502  ;;  %v501_v56 = vpop.permute.xlu0 %500 }
 0x29e   : > { %v518_v28 = vrot.slane %v503_v35, 7  ;;  %v515_v29 = vrot.slane %v501_v56, 7  ;;  %v537_v19 = vrot.slane %v503_v35, 1  ;;  %v534_v58 = vrot.slane %v501_v56, 1 }
 0x29f   : > { %v546_v39 = vadd.f32 %v540_v25, %v527_v8  ;;  %v547_v59 = vadd.f32 %v543_v17, %v528_v9 }
 0x2a0   : > { %v522_v45 = vsel %vm520_vm3, %v515_v29, %v518_v28  ;;  %v525_v21 = vsel %vm520_vm3, %v518_v28, %v515_v29  ;;  %1614 = vadd.xlane.f32.xlu1 %v1613_v51  ;;  %v541_v53 = vsel %vm539_vm1, %v534_v58, %v537_v19  ;;  %v544_v27 = vsel %vm539_vm1, %v537_v19, %v534_v58 }
 0x2a1   : > { %v552_v63 = vmul.f32 0.11111111, %v546_v39  ;;  %v663_v40 = vpop.permute.xlu1 %662  ;;  %v661_v41 = vpop.permute.xlu0 %660  ;;  %v529_v12 = vadd.f32 %v525_v21, %v501_v56  ;;  %v530_v23 = vadd.f32 %v522_v45, %v503_v35  ;;  %v553_v36 = vmul.f32 0.11111111, %v547_v59 }
 0x2a2   : > { %v681_v52 = vrot.slane %v663_v40, 7  ;;  %v699_v30 = vrot.slane %v663_v40, 1  ;;  %v678_v55 = vrot.slane %v661_v41, 7  ;;  %v696_v34 = vrot.slane %v661_v41, 1 }
 0x2a3   : > { %v3265_v14 = vmul.f32 %v552_v63, %v552_v63  ;;  %v548_v7 = vadd.f32 %v541_v53, %v529_v12  ;;  %v549_v5 = vadd.f32 %v544_v27, %v530_v23 }
 0x2a4   : > { %v684_v32 = vsel %vm520_vm3, %v678_v55, %v681_v52  ;;  %v687_v54 = vsel %vm520_vm3, %v681_v52, %v678_v55  ;;  %v702_v3 = vsel %vm539_vm1, %v696_v34, %v699_v30  ;;  %v705_v62 = vsel %vm539_vm1, %v699_v30, %v696_v34 }
 0x2a5   : > { %v690_v16 = vadd.f32 %v687_v54, %v661_v41  ;;  %v691_v0 = vadd.f32 %v684_v32, %v663_v40  ;;  %v667_v6 = vpop.permute.xlu1 %666  ;;  %v665_v4 = vpop.permute.xlu0 %664  ;;  %v3295_v41 = vmul.f32 %v553_v36, %v553_v36  ;;  %v554_v52 = vmul.f32 0.11111111, %v548_v7 }
 0x2a6   : > { %v682_v44 = vrot.slane %v667_v6, 7  ;;  %v700_v18 = vrot.slane %v667_v6, 1  ;;  %v679_v46 = vrot.slane %v665_v4, 7  ;;  %v697_v47 = vrot.slane %v665_v4, 1 }
 0x2a7   : > { %v708_v48 = vadd.f32 %v702_v3, %v690_v16  ;;  %v709_v20 = vadd.f32 %v705_v62, %v691_v0  ;;  %v555_v30 = vmul.f32 0.11111111, %v549_v5 }
 0x2a8   : > { %v685_v1 = vsel %vm520_vm3, %v679_v46, %v682_v44  ;;  %v688_v60 = vsel %vm520_vm3, %v682_v44, %v679_v46  ;;  %v703_v50 = vsel %vm539_vm1, %v697_v47, %v700_v18  ;;  %v706_v24 = vsel %vm539_vm1, %v700_v18, %v697_v47 }
 0x2a9   : > { %v714_v51 = vmul.f32 0.11111111, %v708_v48  ;;  %v715_v8 = vmul.f32 0.11111111, %v709_v20  ;;  %v692_v9 = vadd.f32 %v688_v60, %v665_v4  ;;  %v693_v35 = vadd.f32 %v685_v1, %v667_v6  ;;  %v507_v56 = vpop.permute.xlu1 %506  ;;  %v505_v22 = vpop.permute.xlu0 %504 }
 0x2aa   : > { %v519_v15 = vrot.slane %v507_v56, 7  ;;  %v538_v25 = vrot.slane %v507_v56, 1  ;;  %v516_v28 = vrot.slane %v505_v22, 7  ;;  %v535_v29 = vrot.slane %v505_v22, 1 }
 0x2ab   : > { %v3283_v17 = vmul.f32 %v714_v51, %v552_v63  ;;  %v3285_v39 = vmul.f32 %v715_v8, %v553_v36  ;;  %v3287_v19 = vmul.f32 %v714_v51, %v714_v51  ;;  %v3289_v58 = vmul.f32 %v715_v8, %v715_v8 }
 0x2ac   : > { %v710_v59 = vadd.f32 %v703_v50, %v692_v9  ;;  %v711_v45 = vadd.f32 %v706_v24, %v693_v35  ;;  %v523_v21 = vsel %vm520_vm3, %v516_v28, %v519_v15  ;;  %v526_v40 = vsel %vm520_vm3, %v519_v15, %v516_v28 }
 0x2ad   : > { %v1260_v63 = vmul.f32 2.0, %v3283_v17  ;;  %v671_v55 = vpop.permute.xlu1 %670  ;;  %v669_v34 = vpop.permute.xlu0 %668  ;;  %v1261_v12 = vmul.f32 2.0, %v3285_v39  ;;  %v531_v27 = vadd.f32 %v526_v40, %v505_v22  ;;  %v1290_v32 = vadd.f32 %v3287_v19, %v3265_v14 }
 0x2ae   : > { %v716_v23 = vmul.f32 0.11111111, %v710_v59  ;;  %v717_v53 = vmul.f32 0.11111111, %v711_v45  ;;  %v1291_v54 = vadd.f32 %v3289_v58, %v3295_v41  ;;  %v532_v16 = vadd.f32 %v523_v21, %v507_v56 }
 0x2af   : > { %v3304_v36 = vmul.f32 1.442695, %v3257_v43  ;;  %v542_v6 = vsel %vm539_vm1, %v535_v29, %v538_v25  ;;  %v3314_v4 = vmul.f32 %v554_v52, %v554_v52  ;;  %v683_v46 = vrot.slane %v671_v55, 7 }
 0x2b0   : > { %v3306_v0 = vmul.f32 %v716_v23, %v554_v52  ;;  %v3308_v3 = vmul.f32 %v717_v53, %v555_v30  ;;  %v3310_v62 = vmul.f32 %v716_v23, %v716_v23  ;;  %v3316_v44 = vmul.f32 %v717_v53, %v717_v53 }
 0x2b1   : > { %v550_v18 = vadd.f32 %v542_v6, %v531_v27  ;;  %v831_v47 = vpop.permute.xlu1 %830  ;;  %v829_v7 = vpop.permute.xlu0 %828  ;;  %v3318_v5 = vmul.f32 %v555_v30, %v555_v30  ;;  %v3320_v43 = vadd.f32 0.0001, %v1260_v63  ;;  %v3322_v48 = vadd.f32 0.0001, %v1261_v12 }
 0x2b2   : > { %v1262_v20 = vmul.f32 2.0, %v3306_v0  ;;  %v3325_v1 = vadd.f32 0.0001, %v1290_v32  ;;  %v1292_v60 = vadd.f32 %v3310_v62, %v3314_v4  ;;  %v545_v50 = vsel %vm539_vm1, %v538_v25, %v535_v29 }
 0x2b3   : > { %v680_v24 = vrot.slane %v669_v34, 7  ;;  %v3331_v51 = vadd.f32 0.0001, %v1291_v54  ;;  %v3334_v8 = vmul.f32 2.0, %v3308_v3  ;;  %v551_v9 = vadd.f32 %v545_v50, %v532_v16 }
 0x2b4   : > { %v701_v35 = vrot.slane %v671_v55, 1  ;;  %v3336_v56 = vadd.f32 0.0001, %v1262_v20  ;;  %v1293_v22 = vadd.f32 %v3316_v44, %v3318_v5  ;;  %v556_v15 = vmul.f32 0.11111111, %v550_v18 }
 0x2b5   : > { %v686_v28 = vsel %vm520_vm3, %v680_v24, %v683_v46  ;;  %v835_v59 = vpop.permute.xlu1 %834  ;;  %v833_v45 = vpop.permute.xlu0 %832  ;;  %v689_v25 = vsel %vm520_vm3, %v683_v46, %v680_v24  ;;  %v698_v21 = vrot.slane %v669_v34, 1  ;;  %v849_v40 = vrot.slane %v831_v47, 7 }
 0x2b6   : > { %v695_v29 = vadd.f32 %v686_v28, %v671_v55  ;;  %v3344_v52 = vadd.f32 0.0001, %v1292_v60  ;;  %v694_v30 = vadd.f32 %v689_v25, %v669_v34  ;;  %v867_v63 = vrot.slane %v831_v47, 1 }
 0x2b7   : > { %v846_v12 = vrot.slane %v829_v7, 7  ;;  %v557_v23 = vmul.f32 0.11111111, %v551_v9  ;;  %v704_v53 = vsel %vm539_vm1, %v698_v21, %v701_v35  ;;  %v707_v27 = vsel %vm539_vm1, %v701_v35, %v698_v21 }
 0x2b8   : > { %v864_v32 = vrot.slane %v829_v7, 1  ;;  %v712_v54 = vadd.f32 %v704_v53, %v694_v30  ;;  %v713_v16 = vadd.f32 %v707_v27, %v695_v29  ;;  %v850_v50 = vrot.slane %v835_v59, 7 }
 0x2b9   : > { %v852_v55 = vsel %vm520_vm3, %v846_v12, %v849_v40  ;;  %v855_v6 = vsel %vm520_vm3, %v849_v40, %v846_v12  ;;  %v999_v18 = vpop.permute.xlu1 %998  ;;  %v997_v34 = vpop.permute.xlu0 %996  ;;  %v847_v28 = vrot.slane %v833_v45, 7  ;;  %v3358_v25 = vmul.f32 %v556_v15, %v556_v15 }
 0x2ba   : > { %v858_v46 = vadd.f32 %v855_v6, %v829_v7  ;;  %v859_v20 = vadd.f32 %v852_v55, %v831_v47  ;;  %v870_v60 = vsel %vm539_vm1, %v864_v32, %v867_v63  ;;  %v718_v24 = vmul.f32 0.11111111, %v712_v54 }
 0x2bb   : > { %v719_v9 = vmul.f32 0.11111111, %v713_v16  ;;  %v873_v35 = vsel %vm539_vm1, %v867_v63, %v864_v32  ;;  %v3360_v29 = vmul.f32 %v557_v23, %v557_v23  ;;  %v868_v47 = vrot.slane %v835_v59, 1 }
 0x2bc   : > { %v876_v21 = vadd.f32 %v870_v60, %v858_v46  ;;  %v877_v40 = vadd.f32 %v873_v35, %v859_v20  ;;  %v3362_v30 = vmul.f32 %v718_v24, %v718_v24  ;;  %v865_v12 = vrot.slane %v833_v45, 1 }
 0x2bd   : > { %v3364_v7 = vmul.f32 %v719_v9, %v719_v9  ;;  %v1003_v53 = vpop.permute.xlu1 %1002  ;;  %v853_v63 = vsel %vm520_vm3, %v847_v28, %v850_v50  ;;  %v856_v32 = vsel %vm520_vm3, %v850_v50, %v847_v28  ;;  %v1001_v16 = vpop.permute.xlu0 %1000  ;;  %v3374_v55 = vadd.f32 0.0001, %v1293_v22 }
 0x2be   : > { %v3366_v27 = vmul.f32 0.11111111, %v876_v21  ;;  %v3368_v54 = vmul.f32 0.11111111, %v877_v40  ;;  %v1294_v6 = vadd.f32 %v3362_v30, %v3358_v25  ;;  %v1017_v20 = vrot.slane %v999_v18, 7 }
 0x2bf   : > { %v1295_v46 = vadd.f32 %v3364_v7, %v3360_v29  ;;  %v3380_v60 = vmul.f32 %v718_v24, %v556_v15  ;;  %v3382_v35 = vmul.f32 %v719_v9, %v557_v23  ;;  %v860_v21 = vadd.f32 %v856_v32, %v833_v45 }
 0x2c0   : > { %v861_v40 = vadd.f32 %v853_v63, %v835_v59  ;;  %v3384_v38 = vadd.f32 0.0001, %v1294_v6  ;;  %v1242_v50 = vsub.f32 %v3366_v27, %v3265_v14  ;;  %v1243_v22 = vsub.f32 %v3368_v54, %v3295_v41 }
 0x2c1   : > { %v871_v28 = vsel %vm539_vm1, %v865_v12, %v868_v47  ;;  %v839_v11 = vpop.permute.xlu1 %838  ;;  %v3392_v37 = vadd.f32 0.0001, %v1295_v46  ;;  %v874_v15 = vsel %vm539_vm1, %v868_v47, %v865_v12  ;;  %v1035_v45 = vrot.slane %v999_v18, 1  ;;  %v837_v41 = vpop.permute.xlu0 %836 }
 0x2c2   : > { %v878_v23 = vadd.f32 %v871_v28, %v860_v21  ;;  %v879_v59 = vadd.f32 %v874_v15, %v861_v40  ;;  %v1014_v24 = vrot.slane %v997_v34, 7  ;;  %v1032_v9 = vrot.slane %v997_v34, 1 }
 0x2c3   : > { %v1018_v63 = vrot.slane %v1003_v53, 7  ;;  %v1036_v14 = vrot.slane %v1003_v53, 1  ;;  %v1015_v27 = vrot.slane %v1001_v16, 7  ;;  %v1033_v6 = vrot.slane %v1001_v16, 1 }
 0x2c4   : > { %v884_v32 = vmul.f32 0.11111111, %v878_v23  ;;  %v885_v54 = vmul.f32 0.11111111, %v879_v59  ;;  %v1020_v57 = vsel %vm520_vm3, %v1014_v24, %v1017_v20  ;;  %v1023_v46 = vsel %vm520_vm3, %v1017_v20, %v1014_v24 }
 0x2c5   : > { %v1038_v47 = vsel %vm539_vm1, %v1032_v9, %v1035_v45  ;;  %v1026_v21 = vadd.f32 %v1023_v46, %v997_v34  ;;  %v1027_v40 = vadd.f32 %v1020_v57, %v999_v18  ;;  %v1041_v28 = vsel %vm539_vm1, %v1035_v45, %v1032_v9  ;;  %v3405_v15 = vpop.permute.xlu1 %1006  ;;  %v1005_v13 = vpop.permute.xlu0 %1004 }
 0x2c6   : > { %v1244_v12 = vsub.f32 %v884_v32, %v3314_v4  ;;  %v1245_v23 = vsub.f32 %v885_v54, %v3318_v5  ;;  %v1021_v59 = vsel %vm520_vm3, %v1015_v27, %v1018_v63  ;;  %v1024_v20 = vsel %vm520_vm3, %v1018_v63, %v1015_v27 }
 0x2c7   : > { %v1039_v24 = vsel %vm539_vm1, %v1033_v6, %v1036_v14  ;;  %v1044_v2 = vadd.f32 %v1038_v47, %v1026_v21  ;;  %v1045_v4 = vadd.f32 %v1041_v28, %v1027_v40  ;;  %v1028_v34 = vadd.f32 %v1024_v20, %v1001_v16 }
 0x2c8   : > { %v1029_v57 = vadd.f32 %v1021_v59, %v1003_v53  ;;  %v1042_v18 = vsel %vm539_vm1, %v1036_v14, %v1033_v6  ;;  %v851_v45 = vrot.slane %v839_v11, 7  ;;  %v869_v9 = vrot.slane %v839_v11, 1 }
 0x2c9   : > { %v848_v32 = vrot.slane %v837_v41, 7  ;;  %v1050_v5 = vmul.f32 0.11111111, %v1044_v2  ;;  %v1051_v54 = vmul.f32 0.11111111, %v1045_v4  ;;  %v1046_v46 = vadd.f32 %v1039_v24, %v1028_v34  ;;  %v1167_v2 = vpop.permute.xlu1 %1166 }
 0x2ca   : > { %v1047_v10 = vadd.f32 %v1042_v18, %v1029_v57  ;;  %v866_v47 = vrot.slane %v837_v41, 1  ;;  %v1019_v53 = vrot.slane %v3405_v15, 7 }
 0x2cb   : > { %v854_v63 = vsel %vm520_vm3, %v848_v32, %v851_v45  ;;  %v857_v27 = vsel %vm520_vm3, %v851_v45, %v848_v32  ;;  %v1248_v16 = vsub.f32 %v1050_v5, %v3287_v19  ;;  %v1249_v14 = vsub.f32 %v1051_v54, %v3289_v58  ;;  %v1165_v5 = vpop.permute.xlu0 %1164 }
 0x2cc   : > { %v1052_v6 = vmul.f32 0.11111111, %v1046_v46  ;;  %v1053_v21 = vmul.f32 0.11111111, %v1047_v10  ;;  %v862_v40 = vadd.f32 %v857_v27, %v837_v41  ;;  %v863_v28 = vadd.f32 %v854_v63, %v839_v11 }
 0x2cd   : > { %v872_v59 = vsel %vm539_vm1, %v866_v47, %v869_v9  ;;  %v875_v20 = vsel %vm539_vm1, %v869_v9, %v866_v47  ;;  %v1302_v24 = vadd.f32 %v1248_v16, %v1242_v50  ;;  %v1303_v4 = vadd.f32 %v1249_v14, %v1243_v22  ;;  %v1171_v27 = vpop.permute.xlu1 %1170 }
 0x2ce   : > { %v1250_v34 = vsub.f32 %v1052_v6, %v3310_v62  ;;  %v1251_v57 = vsub.f32 %v1053_v21, %v3316_v44  ;;  %v880_v19 = vadd.f32 %v872_v59, %v862_v40  ;;  %v881_v18 = vadd.f32 %v875_v20, %v863_v28 }
 0x2cf   : > { %v1037_v58 = vrot.slane %v3405_v15, 1  ;;  %v1016_v10 = vrot.slane %v1005_v13, 7  ;;  %v1308_v45 = vadd.f32 0.0009, %v1302_v24  ;;  %v1309_v41 = vadd.f32 0.0009, %v1303_v4  ;;  %v1169_v28 = vpop.permute.xlu0 %1168 }
 0x2d0   : > { %v1304_v11 = vadd.f32 %v1250_v34, %v1244_v12  ;;  %v1305_v32 = vadd.f32 %v1251_v57, %v1245_v23  ;;  %v886_v54 = vmul.f32 0.11111111, %v880_v19  ;;  %v887_v46 = vmul.f32 0.11111111, %v881_v18 }
 0x2d1   : > { %v1022_v50 = vsel %vm520_vm3, %v1016_v10, %v1019_v53  ;;  %v1025_v62 = vsel %vm520_vm3, %v1019_v53, %v1016_v10  ;;  %v1314_v44 = vmul.f32 %v1308_v45, %v3325_v1  ;;  %v1315_v22 = vmul.f32 %v1309_v41, %v3331_v51  ;;  %v1175_v4 = vpop.permute.xlu1 %1174 }
 0x2d2   : > { %v1310_v9 = vadd.f32 0.0009, %v1304_v11  ;;  %v1311_v63 = vadd.f32 0.0009, %v1305_v32  ;;  %v1246_v47 = vsub.f32 %v886_v54, %v3358_v25  ;;  %v1247_v12 = vsub.f32 %v887_v46, %v3360_v29 }
 0x2d3   : > { %v1030_v23 = vadd.f32 %v1025_v62, %v1005_v13  ;;  %v1031_v16 = vadd.f32 %v1022_v50, %v3405_v15  ;;  %1923 = vrcp.f32 %v1314_v44  ;;  %v1034_v53 = vrot.slane %v1005_v13, 1  ;;  %v1173_v44 = vpop.permute.xlu0 %1172 }
 0x2d4   : > { %v1316_v14 = vmul.f32 %v1310_v9, %v3344_v52  ;;  %v1317_v6 = vmul.f32 %v1311_v63, %v3374_v55  ;;  %1925 = vrcp.f32 %v1315_v22  ;;  %v1185_v1 = vrot.slane %v1167_v2, 7 }
 0x2d5   : > { %v1203_v21 = vrot.slane %v1167_v2, 1  ;;  %v1182_v51 = vrot.slane %v1165_v5, 7  ;;  %v1040_v40 = vsel %vm539_vm1, %v1034_v53, %v1037_v58  ;;  %v1043_v25 = vsel %vm539_vm1, %v1037_v58, %v1034_v53  ;;  %v1404_v53 = vpop.permute.xlu1 %1403 }
 0x2d6   : > { %1927 = vrcp.f32 %v1316_v14  ;;  %v1200_v29 = vrot.slane %v1165_v5, 1  ;;  %v1048_v15 = vadd.f32 %v1040_v40, %v1030_v23  ;;  %v1049_v59 = vadd.f32 %v1043_v25, %v1031_v16 }
 0x2d7   : > { %1929 = vrcp.f32 %v1317_v6  ;;  %v1188_v52 = vsel %vm520_vm3, %v1182_v51, %v1185_v1  ;;  %v1191_v13 = vsel %vm520_vm3, %v1185_v1, %v1182_v51  ;;  %v1186_v18 = vrot.slane %v1171_v27, 7 }
 0x2d8   : > { %v1195_v55 = vadd.f32 %v1188_v52, %v1167_v2  ;;  %v1206_v20 = vsel %vm539_vm1, %v1200_v29, %v1203_v21  ;;  %v1209_v24 = vsel %vm539_vm1, %v1203_v21, %v1200_v29  ;;  %v1054_v34 = vmul.f32 0.11111111, %v1048_v15 }
 0x2d9   : > { %v1055_v57 = vmul.f32 0.11111111, %v1049_v59  ;;  %v1194_v19 = vadd.f32 %v1191_v13, %v1165_v5  ;;  %v1204_v10 = vrot.slane %v1171_v27, 1  ;;  %v1183_v45 = vrot.slane %v1169_v28, 7 }
 0x2da   : > { %v1213_v58 = vadd.f32 %v1209_v24, %v1195_v55  ;;  %v1201_v41 = vrot.slane %v1169_v28, 1  ;;  %v1252_v11 = vsub.f32 %v1054_v34, %v3362_v30  ;;  %v1187_v54 = vrot.slane %v1175_v4, 7  ;;  %v3471_v34 = vpop.permute.xlu0 %1401 }
 0x2db   : > { %v1253_v32 = vsub.f32 %v1055_v57, %v3364_v7  ;;  %v1212_v2 = vadd.f32 %v1206_v20, %v1194_v19  ;;  %v1189_v50 = vsel %vm520_vm3, %v1183_v45, %v1186_v18  ;;  %v1192_v62 = vsel %vm520_vm3, %v1186_v18, %v1183_v45 }
 0x2dc   : > { %v1219_v46 = vmul.f32 0.11111111, %v1213_v58  ;;  %v1207_v5 = vsel %vm539_vm1, %v1201_v41, %v1204_v10  ;;  %v1306_v22 = vadd.f32 %v1252_v11, %v1246_v47  ;;  %v1196_v23 = vadd.f32 %v1192_v62, %v1169_v28 }
 0x2dd   : > { %v1307_v9 = vadd.f32 %v1253_v32, %v1247_v12  ;;  %v1218_v63 = vmul.f32 0.11111111, %v1212_v2  ;;  %v1924_v30 = vpop.eup %1923  ;;  %v1197_v16 = vadd.f32 %v1189_v50, %v1171_v27  ;;  %v1210_v14 = vsel %vm539_vm1, %v1204_v10, %v1201_v41  ;;  %v1408_v10 = vpop.permute.xlu1 %1407 }
 0x2de   : > { %v1255_v7 = vsub.f32 %v1219_v46, %v3285_v39  ;;  %v1205_v6 = vrot.slane %v1175_v4, 1  ;;  %v1926_v1 = vpop.eup %1925  ;;  %v1312_v21 = vadd.f32 0.0009, %v1306_v22  ;;  %v1214_v25 = vadd.f32 %v1207_v5, %v1196_v23 }
 0x2df   : > { %v1313_v51 = vadd.f32 0.0009, %v1307_v9  ;;  %v1254_v40 = vsub.f32 %v1218_v63, %v3283_v17  ;;  %v1215_v12 = vadd.f32 %v1210_v14, %v1197_v16  ;;  %v1184_v15 = vrot.slane %v1173_v44, 7  ;;  %v1406_v9 = vpop.permute.xlu0 %1405  ;;  %v1944_v16 = vld [vmem:[%s2456_s8 + $0x18] sm:$0xff] }
 0x2e0   : > { %v1928_v29 = vpop.eup %1927  ;;  %v1273_v47 = vmul.f32 2.0, %v1255_v7  ;;  %v1202_v28 = vrot.slane %v1173_v44, 1  ;;  %v1318_v39 = vmul.f32 %v1312_v21, %v3384_v38  ;;  %v1220_v13 = vmul.f32 0.11111111, %v1214_v25  ;;  %v1945_v25 = vld [vmem:[%s2456_s8] sm:$0xff] }
 0x2e1   : > { %v1930_v59 = vpop.eup %1929  ;;  %v1319_v27 = vmul.f32 %v1313_v51, %v3392_v37  ;;  %v1272_v52 = vmul.f32 2.0, %v1254_v40  ;;  %v1221_v20 = vmul.f32 0.11111111, %v1215_v12  ;;  %v1190_v24 = vsel %vm520_vm3, %v1184_v15, %v1187_v54 }
 0x2e2   : > { %v1279_v55 = vadd.f32 0.0009, %v1273_v47  ;;  %v1193_v17 = vsel %vm520_vm3, %v1187_v54, %v1184_v15  ;;  %1931 = vrcp.f32 %v1318_v39  ;;  %v1256_v19 = vsub.f32 %v1220_v13, %v3306_v0 }
 0x2e3   : > { %v1278_v57 = vadd.f32 0.0009, %v1272_v52  ;;  %v1198_v18 = vadd.f32 %v1193_v17, %v1173_v44  ;;  %1933 = vrcp.f32 %v1319_v27  ;;  %v1257_v37 = vsub.f32 %v1221_v20, %v3308_v3  ;;  %v1410_v17 = vpop.permute.xlu0 %1409 }
 0x2e4   : > { %v1285_v38 = vmul.f32 %v1279_v55, %v3322_v48  ;;  %v1199_v58 = vadd.f32 %v1190_v24, %v1175_v4  ;;  %v1274_v41 = vmul.f32 2.0, %v1256_v19  ;;  %v1208_v11 = vsel %vm539_vm1, %v1202_v28, %v1205_v6  ;;  %v1943_v4 = vld [vmem:[%s2456_s8 + $0x8] sm:$0xff]  ;;  %v1946_v24 = vld [vmem:[%s2456_s8 + $0x10] sm:$0xff] }
 0x2e5   : > { %v1284_v45 = vmul.f32 %v1278_v57, %v3320_v43  ;;  %v1211_v32 = vsel %vm539_vm1, %v1205_v6, %v1202_v28  ;;  %v1275_v0 = vmul.f32 2.0, %v1257_v37  ;;  %v1216_v54 = vadd.f32 %v1208_v11, %v1198_v18  ;;  %v1947_v11 = vld [vmem:[%s2456_s8 + $0x28] sm:$0xff] }
 0x2e6   : > { %v1323_v2 = vmul.f32 %v1926_v1, %v1285_v38  ;;  %v1217_v46 = vadd.f32 %v1211_v32, %v1199_v58  ;;  %v1269_v48 = vadd.f32 0.0001, %v3334_v8  ;;  %v1280_v3 = vadd.f32 0.0009, %v1274_v41  ;;  %v1412_v1 = vpop.permute.xlu1 %1411 }
 0x2e7   : > { %v1321_v50 = vmul.f32 %v1924_v30, %v1284_v45  ;;  %v1420_v62 = vsub.f32 %v1943_v4, %v1404_v53  ;;  %v1264_v43 = vmul.f32 2.0, %v3380_v60  ;;  %v1265_v5 = vmul.f32 2.0, %v3382_v35 }
 0x2e8   : > { %v1281_v44 = vadd.f32 0.0009, %v1275_v0  ;;  %v1222_v22 = vmul.f32 0.11111111, %v1216_v54  ;;  %v1333_v63 = vsub.f32 1.0, %v1323_v2  ;;  %v1286_v23 = vmul.f32 %v1280_v3, %v3336_v56  ;;  %v1948_v2 = vld [vmem:[%s2456_s8 + $0x20] sm:$0xff] }
 0x2e9   : > { %v1223_v7 = vmul.f32 0.11111111, %v1217_v46  ;;  %v1422_v14 = vsub.f32 %v1944_v16, %v1408_v10  ;;  %v1332_v6 = vsub.f32 1.0, %v1321_v50  ;;  %v3489_v53 = vmul.f32 1.442695, %v3259_v49 }
 0x2ea   : > { %v1287_v8 = vmul.f32 %v1281_v44, %v1269_v48  ;;  %v1258_v30 = vsub.f32 %v1222_v22, %v3380_v60  ;;  %v1325_v21 = vmul.f32 %v1928_v29, %v1286_v23  ;;  %v1426_v40 = vand.u32 2147483647, %v1420_v62 }
 0x2eb   : > { %v1259_v51 = vsub.f32 %v1223_v7, %v3382_v35  ;;  %v1419_v47 = vsub.f32 %v1945_v25, %v3471_v34  ;;  %v1270_v56 = vadd.f32 0.0001, %v1264_v43  ;;  %v1271_v12 = vadd.f32 0.0001, %v1265_v5 }
 0x2ec   : > { %v1327_v15 = vmul.f32 %v1930_v59, %v1287_v8  ;;  %v1276_v28 = vmul.f32 2.0, %v1258_v30  ;;  %v1932_v39 = vpop.eup %1931  ;;  %v1339_v27 = vmul.f32 0.5, %v1333_v63  ;;  %v1334_v52 = vsub.f32 1.0, %v1325_v21 }
 0x2ed   : > { %v1277_v60 = vmul.f32 2.0, %v1259_v51  ;;  %v1428_v13 = vand.u32 2147483647, %v1422_v14  ;;  %v1934_v55 = vpop.eup %1933  ;;  %v1338_v49 = vmul.f32 0.5, %v1332_v6  ;;  %v1421_v35 = vsub.f32 %v1946_v24, %v1406_v9 }
 0x2ee   : > { %v1335_v20 = vsub.f32 1.0, %v1327_v15  ;;  %v1282_v29 = vadd.f32 0.0009, %v1276_v28  ;;  %v3495_v57 = vpop.permute.xlu1 %1526  ;;  %v1340_v59 = vmul.f32 0.5, %v1334_v52  ;;  %v1436_v19 = vsel %vm382_vm2, %v1426_v40, 0.0  ;;  %v1522_v28 = vpop.permute.xlu0 %1521 }
 0x2ef   : > { %v1283_v34 = vadd.f32 0.0009, %v1277_v60  ;;  %v1425_v18 = vand.u32 2147483647, %v1419_v47  ;;  %v1437_v58 = vsel %vm382_vm2, %v1428_v13, 0.0  ;;  %v1424_v32 = vsub.f32 %v1947_v11, %v1412_v1  ;;  %v1949_v47 = vld [vmem:[%s2473_s23 + $0x8] sm:$0xff] }
 0x2f0   : > { %v1341_v38 = vmul.f32 0.5, %v1335_v20  ;;  %v1288_v37 = vmul.f32 %v1282_v29, %v1270_v56  ;;  %v1427_v10 = vand.u32 2147483647, %v1421_v35  ;;  %v1346_v45 = vmax.f32 %v1340_v59, 0.0 }
 0x2f1   : > { %v1289_v41 = vmul.f32 %v1283_v34, %v1271_v12  ;;  %v1423_v0 = vsub.f32 %v1948_v2, %v1410_v17  ;;  %v1344_v54 = vmax.f32 %v1338_v49, 0.0  ;;  %v1345_v3 = vmax.f32 %v1339_v27, 0.0 }
 0x2f2   : > { %v1347_v46 = vmax.f32 %v1341_v38, 0.0  ;;  %v1329_v48 = vmul.f32 %v1932_v39, %v1288_v37  ;;  %v1432_v50 = vsel %vm382_vm2, %v1427_v10, 0.0  ;;  %v1431_v62 = vsel %vm382_vm2, %v1425_v18, 0.0  ;;  %v3760_v10 = vld [vmem:[#allocation32_spill] sm:$0xff] }
 0x2f3   : > { %v1331_v4 = vmul.f32 %v1934_v55, %v1289_v41  ;;  %v1430_v43 = vand.u32 2147483647, %v1424_v32  ;;  %v1541_v5 = vpop.permute.xlu1 %1540  ;;  %v1352_v44 = vmin.f32 %v1346_v45, 1.0  ;;  %v1438_v9 = vadd.f32 %v1437_v58, %v1436_v19  ;;  %v1545_v58 = vpop.permute.xlu0 %1544 }
 0x2f4   : > { %v1336_v22 = vsub.f32 1.0, %v1329_v48  ;;  %v1429_v63 = vand.u32 2147483647, %v1423_v0  ;;  %v1353_v23 = vmin.f32 %v1347_v46, 1.0  ;;  %v1433_v16 = vadd.f32 %v1432_v50, %v1431_v62  ;;  %v3762_v48 = vld [vmem:[#allocation31_spill] sm:$0xff] }
 0x2f5   : > { %v1337_v7 = vsub.f32 1.0, %v1331_v4  ;;  %v1439_v14 = vsel %vm382_vm2, %v1430_v43, 0.0  ;;  %v1350_v6 = vmin.f32 %v1344_v54, 1.0  ;;  %v1351_v21 = vmin.f32 %v1345_v3, 1.0  ;;  %v3761_v54 = vld [vmem:[#allocation39_spill] sm:$0xff]  ;;  %v3763_v3 = vld [vmem:[#allocation34_spill] sm:$0xff] }
 0x2f6   : > { %v1342_v8 = vmul.f32 0.5, %v1336_v22  ;;  %v1440_v30 = vadd.f32 %v1439_v14, %v1438_v9  ;;  %v1434_v1 = vsel %vm382_vm2, %v1429_v63, 0.0  ;;  %v1550_v56 = vmul.f32 2.0, %v1949_v47 }
 0x2f7   : > { %v1343_v51 = vmul.f32 0.5, %v1337_v7  ;;  %v1435_v40 = vadd.f32 %v1434_v1, %v1433_v16  ;;  %v1532_v25 = vpop.permute.xlu1 %1531  ;;  %v1357_v39 = vsel %vm382_vm2, %v1352_v44, 0.0  ;;  %1935 = vpow2.f32 %v3489_v53  ;;  %v3764_v1 = vld [vmem:[#allocation38_spill] sm:$0xff] }
 0x2f8   : > { %v1348_v12 = vmax.f32 %v1342_v8, 0.0  ;;  %v1442_v15 = vmul.f32 0.33333334, %v1440_v30  ;;  %v1582_v52 = vsel %vm1483_vm4, %v3255_v42, %v3253_v61  ;;  %v1362_v13 = vsel %vm382_vm2, %v1353_v23, 0.0 }
 0x2f9   : > { %v1441_v27 = vmul.f32 0.33333334, %v1435_v40  ;;  %v1349_v60 = vmax.f32 %v1343_v51, 0.0  ;;  %v1356_v20 = vsel %vm382_vm2, %v1350_v6, 0.0  ;;  %1937 = vpow2.f32 %v3304_v36  ;;  %v3765_v40 = vld [vmem:[#allocation33_spill] sm:$0xff] }
 0x2fa   : > { %v1354_v55 = vmin.f32 %v1348_v12, 1.0  ;;  %v1444_v49 = vmul.f32 -10.0, %v1442_v15  ;;  %v1358_v17 = vadd.f32 %v1357_v39, %v1356_v20  ;;  %v1361_v53 = vsel %vm382_vm2, %v1351_v21, 0.0 }
 0x2fb   : > { %v1443_v29 = vmul.f32 -10.0, %v1441_v27  ;;  %v1534_v24 = vpop.permute.xlu1 %1533  ;;  %v1355_v35 = vmin.f32 %v1349_v60, 1.0  ;;  %v1363_v34 = vadd.f32 %v1362_v13, %v1361_v53  ;;  %v1537_v18 = vsel %vm1508_vm8, %v1522_v28, %v1532_v25 }
 0x2fc   : > { %v1447_v42 = vmul.f32 1.442695, %v1444_v49  ;;  %v1538_v59 = vsel %vm1508_vm8, %v3495_v57, %v1534_v24  ;;  %v1359_v36 = vsel %vm382_vm2, %v1354_v55, 0.0  ;;  %v3759_v57 = vld [vmem:[#allocation37_spill] sm:$0xff]  ;;  %v1547_v2 = vsel %vm1479_vm13, %v1541_v5, %v1537_v18 }
 0x2fd   : > { %v1445_v19 = vmul.f32 1.442695, %v1443_v29  ;;  %v1360_v38 = vadd.f32 %v1359_v36, %v1358_v17  ;;  %v1364_v37 = vsel %vm382_vm2, %v1355_v35, 0.0  ;;  %v1572_v45 = vsel %vm1563_vm9, %v3760_v10, %v3759_v57 }
 0x2fe   : > { %1939 = vpow2.f32 %v1447_v42  ;;  %v1365_v41 = vadd.f32 %v1364_v37, %v1363_v34  ;;  %v1548_v11 = vsel %vm1479_vm13, %v1545_v58, %v1538_v59  ;;  %v1584_v0 = vsub.f32 %v1582_v52, %v1550_v56 }
 0x2ff   : > { %1941 = vpow2.f32 %v1445_v19  ;;  %v1367_v32 = vmul.f32 0.33333334, %v1360_v38  ;;  %v1381_v46 = vmul.f32 0.15, %v3761_v54  ;;  %v1583_v50 = vsub.f32 %v1572_v45, %v3762_v48 }
 0x300   : > { %v1368_v31 = vmul.f32 0.33333334, %v1365_v41  ;;  %v1382_v4 = vmul.f32 0.15, %v3763_v3  ;;  %v1552_v44 = vsub.f32 %v1548_v11, %v1550_v56  ;;  %v1551_v63 = vsub.f32 %v1547_v2, %v3762_v48 }
 0x301   : > { %v1383_v62 = vsel %vm1379_vm14, %v1367_v32, 0.0  ;;  %v1936_v43 = vpop.eup %1935  ;;  %v1590_v16 = vand.u32 2147483647, %v1584_v0  ;;  %v1589_v5 = vand.u32 2147483647, %v1583_v50  ;;  %v2175_v35 = vmov 0.0  }
 0x302   : > { %v1384_v22 = vsel %vm1380_vm15, %v1368_v31, 0.0  ;;  %v1385_v9 = vmul.f32 0.85, %v1383_v62  ;;  %v1485_v8 = vsel %vm1483_vm4, 1.0, %v1936_v43  ;;  %v1586_v30 = vand.u32 2147483647, %v1552_v44 }
 0x303   : > { %v1386_v23 = vmul.f32 0.85, %v1384_v22  ;;  %v1938_v7 = vpop.eup %1937  ;;  %v1585_v51 = vand.u32 2147483647, %v1551_v63  ;;  %v1592_v12 = vmul.f32 %v1590_v16, %v1485_v8  ;;  %348 = vst [vmem:[%s3574_s10] sm:$0x1] %v2175_v35  ;;  %vm1641_vm1 = vcmp.eq.s32.totalorder %v3205_v33, 2 }
 0x304   : > { %v1387_v14 = vadd.f32 %v1385_v9, %v1381_v46  ;;  %v1591_v27 = vmul.f32 %v1938_v7, %v1589_v5 }
 0x305   : > { %v1388_v6 = vadd.f32 %v1386_v23, %v1382_v4 }
 0x306   : > { %v1597_v21 = vmul.f32 %v1387_v14, %v3764_v1 }
 0x307   : > { %v1598_v25 = vmul.f32 %v1388_v6, %v3765_v40 }
 0x308   : > { %v1940_v47 = vpop.eup %1939  ;;  %v1599_v56 = vsel %vm382_vm2, %v1597_v21, 0.0 }
 0x309   : > { %v1942_v15 = vpop.eup %1941  ;;  %v1481_v28 = vsel %vm1479_vm13, 1.0, %v1940_v47  ;;  %v1600_v39 = vsel %vm382_vm2, %v1598_v25, 0.0 }
 0x30a   : > { %v1480_v26 = vsel %vm1479_vm13, 1.0, %v1942_v15  ;;  %v1588_v52 = vmul.f32 %v1586_v30, %v1481_v28  ;;  %v1601_v60 = vadd.f32 %v1600_v39, %v1599_v56  ;;  %v1645_v43 = vld [vmem:[%s3574_s10] sm:$0x1] }
 0x30b   : > { %v1587_v13 = vmul.f32 %v1585_v51, %v1480_v26 }
 0x30c   : > { %1602 = vadd.xlane.f32.xlu0 %v1601_v60  ;;  %v1594_v55 = vadd.f32 %v1592_v12, %v1588_v52 }
 0x30d   : > { %v1593_v49 = vadd.f32 %v1591_v27, %v1587_v13 }
 0x30e   : > { %v1624_v20 = vsel %vm382_vm2, %v1594_v55, 0.0 }
 0x30f   : > { %v1623_v29 = vsel %vm382_vm2, %v1593_v49, 0.0 }
 0x310   : > { %v1625_v24 = vadd.f32 %v1624_v20, %v1623_v29 }
 0x312   : > { %1626 = vadd.xlane.f32.xlu0 %v1625_v24 }
 0x32d   : > { %v1615_v17 = vpop.xlane.xlu1 %1614 }
 0x32e   : > { %v1616_v53 = vrot.slane %v1615_v17, 4 }
 0x330   : > { %v1617_v61 = vadd.f32 %v1616_v53, %v1615_v17 }
 0x332   : > { %v1618_v42 = vrot.slane %v1617_v61, 2 }
 0x334   : > { %v1619_v34 = vadd.f32 %v1618_v42, %v1617_v61 }
 0x336   : > { %v1620_v38 = vrot.slane %v1619_v34, 1 }
 0x338   : > { %v1621_v41 = vadd.f32 %v1620_v38, %v1619_v34 }
 0x399   : > { %v1603_v59 = vpop.xlane.xlu0 %1602 }
 0x39a   : > { %v1604_v36 = vrot.slane %v1603_v59, 4 }
 0x39c   : > { %v1605_v19 = vadd.f32 %v1604_v36, %v1603_v59 }
 0x39e   : > { %v1606_v18 = vrot.slane %v1605_v19, 2 }
 0x39f   : > { %v1627_v37 = vpop.xlane.xlu0 %1626 }
 0x3a0   : > { %v1607_v58 = vadd.f32 %v1606_v18, %v1605_v19  ;;  %v1628_v57 = vrot.slane %v1627_v37, 4 }
 0x3a2   : > { %v1608_v10 = vrot.slane %v1607_v58, 1  ;;  %v1629_v45 = vadd.f32 %v1628_v57, %v1627_v37 }
 0x3a4   : > { %v1609_v11 = vadd.f32 %v1608_v10, %v1607_v58  ;;  %v1630_v32 = vrot.slane %v1629_v45, 2 }
 0x3a6   : > { %1826 = vpush %v1609_v11  ;;  %v1631_v2 = vadd.f32 %v1630_v32, %v1629_v45 }
 0x3a7   : > { %1828 = vpush %v1621_v41 }
 0x3a8   : > { %v1632_v0 = vrot.slane %v1631_v2, 1 }
 0x3aa   : > { %v1633_v31 = vadd.f32 %v1632_v0, %v1631_v2 }
 0x3ac   : > { %1830 = vpush %v1633_v31 }
 0x3d7   : > { %s1827_s26 = spop %1826 }
 0x3d8   : > { %v1635_v54 = vstv %s1827_s26  ;;  %s1829_s11 = spop %1828 }
 0x3d9   : > { %v1638_v46 = vstv %s1829_s11  ;;  %v1636_v48 = vsel %vm1508_vm8, %v1635_v54, 0.0 }
 0x3da   : > { %v1639_v50 = vsel %vm1637_vm0, %v1638_v46, 0.0 }
 0x3db   : > { %v1640_v3 = vadd.f32 %v1639_v50, %v1636_v48 }
 0x3dd   : > { %s1831_s22 = spop %1830 }
 0x3de   : > { %v1642_v4 = vstv %s1831_s22 }
 0x3df   : > { %v1643_v62 = vsel %vm1641_vm1, %v1642_v4, 0.0 }
 0x3e0   : > { %v1644_v44 = vadd.f32 %v1643_v62, %v1640_v3 }
 0x3e2   : > { %v1646_v22 = vadd.f32 %v1645_v43, %v1644_v44 }
 0x3e4   : > { %1647 = vst [vmem:[%s3574_s10] sm:$0x1] %v1646_v22 }
 0x3e5   : > { %2083 = shalt.err (!%p2080_p6)
}
 0x3e6   : > { %s2084_s25 = scalar_lea.hbm %s3587_s13, 16  ;;  %s2088_s27 = scalar_lea.hbm %s3640_s4, 64 }
 0x3e7   : > { %p2085_p2 = scmp.ne.s32.totalorder %s3587_s13, %s2084_s25  ;;  %p2089_p0 = scmp.lt.u32.totalorder %s3587_s13, %s3640_s4 }
 0x3e8   : > { %p2090_p3 = scmp.lt.u32.totalorder %s2088_s27, %s2084_s25  ;;  %p2092_p13 = scmp.lt.u32.totalorder %s2084_s25, %s3587_s13 }
 0x3e9   : > { %p2086_p7 = pnand %p2085_p2, %p3766_p1 }
 0x3ea   : > { %p2091_p8 = por %p2090_p3, %p2089_p0 }
 0x3eb   : > { %p2087_p9 = pneg %p2086_p7 }
 0x3ec   : > { %p2093_p10 = por %p2092_p13, %p2091_p8 }
 0x3ee   : > { %p2094_p12 = pnand %p2093_p10, %p2087_p9 }
 0x3f0   : > { %2097 = shalt.err (!%p2094_p12)
}
 0x3f1   : > { %1840 = dma.vmem_to_hbm [thread:$0]  (%p3766_p1), %s3589_s1, 16, %s3587_s13, %s1649_s24  }
 0x3f2 PF: > { %p1860_p11 = scmp.ge.s32.totalorder %s2160_s20, 2  ;;  %s1673_s0 = sand.u32 1, %s2140_s15  }
 0x3f3   : > { %p3767_p5 = scmp.ne.s32.totalorder %s3688_s30, 0  ;;  %s1674_s10 = scalar_lea.sflag [#allocation4], %s1673_s0 }
 0x3f5   : > { %p1856_p4 = pnand %p1860_p11, %p3767_p5 }
 0x3f7   : > { %2135 = dma.done.wait (!%p1856_p4), %s1674_s10, 16  }
 0x3f8   : > { %2137 = vsyncadd (!%p1856_p4), %s1674_s10, 4294967280  ;;  %s26_s20 = sadd.s32 1, %s2160_s20   ;;  %s3768_s28 = sld [smem:[#allocation16_spill]] }
 0x3f9   : > { %p23_p6 = scmp.ge.s32.totalorder %s26_s20, 6   ;;  %s3769_s26 = sld [smem:[#allocation15_spill]] }
 0x3fa   : > { %s3770_s15 = smov %s2144_s16  ;;  %s3771_s16 = smov %s2148_s17 }
 0x3fb   : > { %s3773_s18 = smov %s2156_s19  ;;  %25 = sbr.rel (!%p23_p6) target bundleno = 13 (0xd), region = 122 }
 0x3fe   : > { %s3772_s17 = smov %s3768_s28 }
 0x3ff   : > { %s3774_s19 = smov %s3769_s26 }
 0x402   :  { %1678 = vsyncpa [#allocation3], 1 }
 0x403   :  { %1680 = vsyncpa [#allocation3 + $0x1], 1 }
 0x404   :  { %1681 = vsyncpa [#allocation6], 1 }
 0x405   :  { %1683 = vsyncpa [#allocation6 + $0x1], 1 }
 0x406   :  { %1684 = vsyncpa [#allocation9], 1 }
 0x407   :  { %1686 = vsyncpa [#allocation9 + $0x1], 1 }
 0x408   :  { %1687 = vsyncpa [#allocation4], 1 }
 0x409   :  { %1689 = vsyncpa [#allocation4 + $0x1], 1 }

</bundles_post_ra>
